<compile_context>
chip_gen: v7x
topology: tpu7x:2x2x1
jax: 0.10.0
libtpu: 0.0.40
codegen_flags: <defaults>
</compile_context>

<pallas_src>
import functools

import numpy as np
import jax
import jax.numpy as jnp
from jax import lax
from jax.experimental import pallas as pl
from jax.experimental.pallas import tpu as pltpu


# ----------------------------- Pallas kernels -----------------------------

def _conv_bn_prelu_kernel(p_ref, w_ref, sc_ref, sh_ref, alpha_ref,
                          o_bn_ref, o_act_ref):
    """conv0 (im2col matmul) -> BN1; emits both BN1 output and PReLU(BN1).

    Emitting prelu(x1_bn) here keeps the PReLU on the non-redundant (C, N)
    activation instead of the 9x-redundant patch tensor in the next kernel.
    """
    y = jnp.dot(w_ref[...], p_ref[0], preferred_element_type=jnp.float32)   # (C, TN)
    y = y * sc_ref[...] + sh_ref[...]                                       # BN1
    o_bn_ref[0] = y.astype(o_bn_ref.dtype)
    a = alpha_ref[0]
    o_act_ref[0] = jnp.where(y >= 0, y, a * y).astype(o_act_ref.dtype)      # PReLU


def _mid_block_kernel(p_ref, x1_ref, w1_ref, sc2_ref, sh2_ref,
                      w2_ref, sc3_ref, sh3_ref,
                      wq_ref, bq_ref, wk_ref, bk_ref, wv_ref, bv_ref,
                      alpha_ref, o_ref, q_ref, k_ref, v_ref):
    """conv1 -> BN2 -> maxout(x1_bn) -> PReLU -> conv2(1x1) -> BN3, with the
    Self_Attn q/k/v 1x1 projections fused into the epilogue so the attention
    kernel never recomputes them per key step."""
    a = alpha_ref[0]
    y = jnp.dot(w1_ref[...], p_ref[0], preferred_element_type=jnp.float32)  # conv1 (C, TN)
    y = y * sc2_ref[...] + sh2_ref[...]                                     # BN2
    m = jnp.maximum(y, x1_ref[0].astype(jnp.float32))                       # maxout vs x1_bn
    z = jnp.where(m >= 0, m, a * m).astype(jnp.bfloat16)                    # PReLU
    o = jnp.dot(w2_ref[...], z, preferred_element_type=jnp.float32)         # conv2 (1x1)
    o = o * sc3_ref[...] + sh3_ref[...]                                     # BN3   (C, TN) f32
    o_bf = o.astype(jnp.bfloat16)
    o_ref[0] = o_bf                                                         # attn input / residual
    # q/k in f32 (softmax is sensitive to energy precision; K=C contraction is
    # tiny), v in bf16 (consumed as bf16 by the p.v matmul anyway).
    q = jnp.dot(wq_ref[...], o, preferred_element_type=jnp.float32) + bq_ref[...]
    k = jnp.dot(wk_ref[...], o, preferred_element_type=jnp.float32) + bk_ref[...]
    v = jnp.dot(wv_ref[...], o_bf, preferred_element_type=jnp.float32) + bv_ref[...]
    q_ref[0] = q.astype(q_ref.dtype)
    k_ref[0] = k.astype(k_ref.dtype)
    v_ref[0] = v.astype(v_ref.dtype)


def _attn_bn_kernel(q_ref, k_ref, v_ref, x_ref, sc_ref, sh_ref, gamma_ref,
                    o_ref, m_sc, l_sc, acc_sc):
    """Self_Attn (flash-style online softmax over key tiles, pre-projected
    q/k/v) + gamma residual + BN4."""
    ki = pl.program_id(2)

    @pl.when(ki == 0)
    def _():
        m_sc[...] = jnp.full_like(m_sc, -jnp.inf)
        l_sc[...] = jnp.zeros_like(l_sc)
        acc_sc[...] = jnp.zeros_like(acc_sc)

    q = q_ref[0]                                                   # (C8, TQ) f32
    k = k_ref[0]                                                   # (C8, TK) f32
    # e[j, i] = k_j . q_i : keys on sublanes so per-query softmax stats land
    # lane-dense as (1, TQ) with no transposes anywhere in the update.
    e = lax.dot_general(k, q, (((0,), (0,)), ((), ())),
                        preferred_element_type=jnp.float32)        # (TK, TQ)

    m_prev = m_sc[...]                                             # (1, TQ)
    m_new = jnp.maximum(m_prev, jnp.max(e, axis=0, keepdims=True))
    alpha = jnp.exp(m_prev - m_new)
    # TODO(synk): on v6e/v7x the exp could run on bf16 operands for ~2x EUP
    # throughput; kept f32 so the same kernel is also correct/fast on v5e.
    p = jnp.exp(e - m_new)                                         # (TK, TQ)
    l_sc[...] = alpha * l_sc[...] + jnp.sum(p, axis=0, keepdims=True)
    acc_sc[...] = alpha * acc_sc[...] + jnp.dot(
        v_ref[0], p.astype(jnp.bfloat16),
        preferred_element_type=jnp.float32)                        # (C, TQ)
    m_sc[...] = m_new

    @pl.when(ki == pl.num_programs(2) - 1)
    def _():
        attn_out = acc_sc[...] * pl.reciprocal(l_sc[...], approx=True)
        out = gamma_ref[0] * attn_out + x_ref[0].astype(jnp.float32)   # gamma*attn + x
        o_ref[0] = (out * sc_ref[...] + sh_ref[...]).astype(o_ref.dtype)   # BN4


# ----------------------------- wrappers -----------------------------

def _pick_tile(n, want):
    """Largest multiple of 128 that divides n and is <= want, else the full axis."""
    best = None
    m = 128
    while m <= min(want, n):
        if n % m == 0:
            best = m
        m += 128
    return best if best is not None else n


def conv_bn_prelu(patches, w, scale, shift, alpha, *, tile_n):
    B, K, N = patches.shape
    C = w.shape[0]
    return pl.pallas_call(
        _conv_bn_prelu_kernel,
        out_shape=(jax.ShapeDtypeStruct((B, C, N), jnp.bfloat16),
                   jax.ShapeDtypeStruct((B, C, N), jnp.bfloat16)),
        grid=(B, N // tile_n),
        in_specs=[pl.BlockSpec((1, K, tile_n), lambda b, n: (b, 0, n)),
                  pl.BlockSpec((C, K), lambda b, n: (0, 0)),
                  pl.BlockSpec((C, 1), lambda b, n: (0, 0)),
                  pl.BlockSpec((C, 1), lambda b, n: (0, 0)),
                  pl.BlockSpec(memory_space=pltpu.MemorySpace.SMEM)],
        out_specs=[pl.BlockSpec((1, C, tile_n), lambda b, n: (b, 0, n)),
                   pl.BlockSpec((1, C, tile_n), lambda b, n: (b, 0, n))],
        compiler_params=pltpu.CompilerParams(
            dimension_semantics=("parallel", "parallel")),
    )(patches, w, scale, shift, alpha)


def mid_block(patches, x1_bn, w1, sc2, sh2, w2, sc3, sh3,
              wq, bq, wk, bk, wv, bv, alpha, *, tile_n):
    B, K, N = patches.shape
    C = w1.shape[0]
    C8 = wq.shape[0]
    return pl.pallas_call(
        _mid_block_kernel,
        out_shape=(jax.ShapeDtypeStruct((B, C, N), jnp.bfloat16),    # BN3 out
                   jax.ShapeDtypeStruct((B, C8, N), jnp.float32),    # q
                   jax.ShapeDtypeStruct((B, C8, N), jnp.float32),    # k
                   jax.ShapeDtypeStruct((B, C, N), jnp.bfloat16)),   # v
        grid=(B, N // tile_n),
        in_specs=[pl.BlockSpec((1, K, tile_n), lambda b, n: (b, 0, n)),
                  pl.BlockSpec((1, C, tile_n), lambda b, n: (b, 0, n)),
                  pl.BlockSpec((C, K), lambda b, n: (0, 0)),
                  pl.BlockSpec((C, 1), lambda b, n: (0, 0)),
                  pl.BlockSpec((C, 1), lambda b, n: (0, 0)),
                  pl.BlockSpec((C, C), lambda b, n: (0, 0)),
                  pl.BlockSpec((C, 1), lambda b, n: (0, 0)),
                  pl.BlockSpec((C, 1), lambda b, n: (0, 0)),
                  pl.BlockSpec((C8, C), lambda b, n: (0, 0)),
                  pl.BlockSpec((C8, 1), lambda b, n: (0, 0)),
                  pl.BlockSpec((C8, C), lambda b, n: (0, 0)),
                  pl.BlockSpec((C8, 1), lambda b, n: (0, 0)),
                  pl.BlockSpec((C, C), lambda b, n: (0, 0)),
                  pl.BlockSpec((C, 1), lambda b, n: (0, 0)),
                  pl.BlockSpec(memory_space=pltpu.MemorySpace.SMEM)],
        out_specs=[pl.BlockSpec((1, C, tile_n), lambda b, n: (b, 0, n)),
                   pl.BlockSpec((1, C8, tile_n), lambda b, n: (b, 0, n)),
                   pl.BlockSpec((1, C8, tile_n), lambda b, n: (b, 0, n)),
                   pl.BlockSpec((1, C, tile_n), lambda b, n: (b, 0, n))],
        compiler_params=pltpu.CompilerParams(
            dimension_semantics=("parallel", "parallel")),
    )(patches, x1_bn, w1, sc2, sh2, w2, sc3, sh3, wq, bq, wk, bk, wv, bv, alpha)


def self_attn_bn(q, k, v, x, gamma, scale, shift, *, tile_q, tile_k,
                 vmem_limit_bytes=32 * 1024 * 1024):
    B, C, N = x.shape
    C8 = q.shape[1]
    return pl.pallas_call(
        _attn_bn_kernel,
        out_shape=jax.ShapeDtypeStruct((B, C, N), jnp.float32),
        grid=(B, N // tile_q, N // tile_k),
        in_specs=[pl.BlockSpec((1, C8, tile_q), lambda b, qi, ki: (b, 0, qi)),
                  pl.BlockSpec((1, C8, tile_k), lambda b, qi, ki: (b, 0, ki)),
                  pl.BlockSpec((1, C, tile_k), lambda b, qi, ki: (b, 0, ki)),
                  pl.BlockSpec((1, C, tile_q), lambda b, qi, ki: (b, 0, qi)),
                  pl.BlockSpec((C, 1), lambda b, qi, ki: (0, 0)),
                  pl.BlockSpec((C, 1), lambda b, qi, ki: (0, 0)),
                  pl.BlockSpec(memory_space=pltpu.MemorySpace.SMEM)],
        out_specs=pl.BlockSpec((1, C, tile_q), lambda b, qi, ki: (b, 0, qi)),
        scratch_shapes=[pltpu.VMEM((1, tile_q), jnp.float32),    # running max
                        pltpu.VMEM((1, tile_q), jnp.float32),    # running sum
                        pltpu.VMEM((C, tile_q), jnp.float32)],   # output accumulator
        compiler_params=pltpu.CompilerParams(
            dimension_semantics=("parallel", "parallel", "arbitrary"),
            vmem_limit_bytes=vmem_limit_bytes),
    )(q, k, v, x, scale, shift, gamma)


# ----------------------------- glue -----------------------------

def im2col_kn(x_bchw, kh, kw, dilation, out_dtype=jnp.bfloat16):
    """(B, C, H, W) -> (B, C*kh*kw, H*W); row order (c, ki, kj) matches
    torch weight.reshape(Cout, -1).  Emitted in bf16 to halve HBM traffic."""
    B, C, H, W = x_bchw.shape
    ph = dilation * (kh - 1) // 2
    pw = dilation * (kw - 1) // 2
    xp = jnp.pad(x_bchw, ((0, 0), (0, 0), (ph, ph), (pw, pw)))
    cols = [xp[:, :, ki * dilation:ki * dilation + H, kj * dilation:kj * dilation + W]
            for ki in range(kh) for kj in range(kw)]
    p = jnp.stack(cols, axis=2)                       # (B, C, kh*kw, H, W)
    return p.reshape(B, C * kh * kw, H * W).astype(out_dtype)


def fold_bn(conv_bias, bn_params, eps=1e-5):
    """Fold conv bias + eval-mode BatchNorm into per-channel (scale, shift) columns."""
    g, b, mean, var = bn_params
    s = g * lax.rsqrt(var + eps)
    scale = s.reshape(-1, 1).astype(jnp.float32)
    shift = ((conv_bias - mean) * s + b).reshape(-1, 1).astype(jnp.float32)
    return scale, shift


def competitive_dense_block_input_forward(params, x_nchw, *, kernel_h, kernel_w,
                                          dilation, tile_n=2048, tile_q=1024,
                                          tile_k=1024, eps=1e-5):
    B, Cin, H, W = x_nchw.shape
    N = H * W
    C = params['conv0_w'].shape[0]
    C8 = params['q_w'].shape[0]

    tn = _pick_tile(N, tile_n)
    tq = _pick_tile(N, tile_q)
    tk = _pick_tile(N, tile_k)

    alpha = params['prelu_alpha'].astype(jnp.float32)

    # BN0 on the raw input.  Must be applied before zero padding (padded pixels
    # are zero *after* BN0 in the reference), so it is a cheap XLA affine here.
    g0, b0, m0, v0 = params['bn0']
    s0 = (g0 * lax.rsqrt(v0 + eps)).reshape(1, Cin, 1, 1)
    x0_bn = x_nchw * s0 + (b0.reshape(1, Cin, 1, 1) - m0.reshape(1, Cin, 1, 1) * s0)

    # {conv0 -> BN1 -> PReLU}  (PReLU emitted here, not on the 9x patches)
    p0 = im2col_kn(x0_bn, kernel_h, kernel_w, dilation)            # (B, Cin*kh*kw, N) bf16
    w0 = params['conv0_w'].reshape(C, -1).astype(jnp.bfloat16)
    sc1, sh1 = fold_bn(params['conv0_b'], params['bn1'], eps)
    x1_bn, x1_act = conv_bn_prelu(p0, w0, sc1, sh1, alpha, tile_n=tn)   # (B, C, N) bf16 each

    # {conv1 -> BN2 -> maxout(x1_bn) -> PReLU -> conv2(1x1) -> BN3} + q/k/v proj
    p1 = im2col_kn(x1_act.reshape(B, C, H, W), kernel_h, kernel_w, dilation)
    w1 = params['conv1_w'].reshape(C, -1).astype(jnp.bfloat16)
    sc2, sh2 = fold_bn(params['conv1_b'], params['bn2'], eps)
    w2 = params['conv2_w'].reshape(C, C).astype(jnp.bfloat16)
    sc3, sh3 = fold_bn(params['conv2_b'], params['bn3'], eps)
    wq = params['q_w'].reshape(C8, C).astype(jnp.float32)
    wk = params['k_w'].reshape(C8, C).astype(jnp.float32)
    wv = params['v_w'].reshape(C, C).astype(jnp.bfloat16)
    out3, q, k, v = mid_block(
        p1, x1_bn, w1, sc2, sh2, w2, sc3, sh3,
        wq, params['q_b'].reshape(C8, 1).astype(jnp.float32),
        wk, params['k_b'].reshape(C8, 1).astype(jnp.float32),
        wv, params['v_b'].reshape(C, 1).astype(jnp.float32),
        alpha, tile_n=tn)

    # {Self_Attn -> BN4}   (outblock=False), q/k/v already projected.
    sc4, sh4 = fold_bn(jnp.zeros((C,), jnp.float32), params['bn4'], eps)
    out = self_attn_bn(q, k, v, out3, params['gamma'].astype(jnp.float32),
                       sc4, sh4, tile_q=tq, tile_k=tk)             # (B, C, N) f32

    return out.reshape(B, C, H, W)


# ----------------------------- pure-JAX reference -----------------------------

def reference_forward(params, x, kernel_h, kernel_w, dilation, eps=1e-5):
    def bn(z, p):
        g, b, m, v = p
        sh = (1, -1, 1, 1)
        return (z - m.reshape(sh)) * (g.reshape(sh) / jnp.sqrt(v.reshape(sh) + eps)) + b.reshape(sh)

    def prelu(z):
        a = params['prelu_alpha'][0]
        return jnp.where(z >= 0, z, a * z)

    def conv(z, w, b, dil):
        ph = dil * (w.shape[2] - 1) // 2
        pw = dil * (w.shape[3] - 1) // 2
        y = lax.conv_general_dilated(z, w, (1, 1), ((ph, ph), (pw, pw)),
                                     rhs_dilation=(dil, dil),
                                     dimension_numbers=('NCHW', 'OIHW', 'NCHW'))
        return y + b.reshape(1, -1, 1, 1)

    x0_bn = bn(x, params['bn0'])
    x0 = conv(x0_bn, params['conv0_w'], params['conv0_b'], dilation)
    x1_bn = bn(x0, params['bn1'])
    x1 = conv(prelu(x1_bn), params['conv1_w'], params['conv1_b'], dilation)
    x2_bn = bn(x1, params['bn2'])
    x2 = prelu(jnp.maximum(x2_bn, x1_bn))
    out = bn(conv(x2, params['conv2_w'], params['conv2_b'], 1), params['bn3'])

    B, C, H, W = out.shape
    N = H * W
    q = conv(out, params['q_w'], params['q_b'], 1).reshape(B, -1, N)
    k = conv(out, params['k_w'], params['k_b'], 1).reshape(B, -1, N)
    v = conv(out, params['v_w'], params['v_b'], 1).reshape(B, C, N)
    energy = jnp.einsum('bci,bcj->bij', q, k)
    attn = jax.nn.softmax(energy, axis=-1)
    att_out = jnp.einsum('bcj,bij->bci', v, attn).reshape(B, C, H, W)
    out = params['gamma'][0] * att_out + out
    return bn(out, params['bn4'])


# ----------------------------- test driver -----------------------------

if __name__ == "__main__":
    key = jax.random.PRNGKey(0)
    B, Cin, C, H, W = 2, 8, 32, 16, 16
    kernel_h = kernel_w = 3
    dilation = 1
    C8 = C // 8

    kit = iter(jax.random.split(key, 40))

    def nrm(shape, s=0.1):
        return s * jax.random.normal(next(kit), shape, jnp.float32)

    def bn_params(nf):
        return (1.0 + 0.1 * jax.random.normal(next(kit), (nf,), jnp.float32),
                0.1 * jax.random.normal(next(kit), (nf,), jnp.float32),
                0.1 * jax.random.normal(next(kit), (nf,), jnp.float32),
                0.5 + jnp.abs(jax.random.normal(next(kit), (nf,), jnp.float32)))

    params = {
        'conv0_w': nrm((C, Cin, kernel_h, kernel_w)),
        'conv0_b': nrm((C,)),
        'conv1_w': nrm((C, C, kernel_h, kernel_w)),
        'conv1_b': nrm((C,)),
        'conv2_w': nrm((C, C, 1, 1)),
        'conv2_b': nrm((C,)),
        'q_w': nrm((C8, C, 1, 1)),
        'q_b': nrm((C8,)),
        'k_w': nrm((C8, C, 1, 1)),
        'k_b': nrm((C8,)),
        'v_w': nrm((C, C, 1, 1)),
        'v_b': nrm((C,)),
        # Self_Attn.gamma is torch.zeros(1) at init; use a nonzero value so the
        # attention path actually contributes to the output in this test.
        'gamma': jnp.array([0.1], jnp.float32),
        'prelu_alpha': jnp.array([0.25], jnp.float32),   # nn.PReLU() default init
        'bn0': bn_params(Cin),
        'bn1': bn_params(C),
        'bn2': bn_params(C),
        'bn3': bn_params(C),
        'bn4': bn_params(C),
    }

    x = jax.random.normal(next(kit), (B, Cin, H, W), jnp.float32)

    # Small tiles so the spatial / query / key grids all have >1 step on this
    # toy problem (production sizes use the larger defaults: 2048/1024/1024).
    fwd = jax.jit(functools.partial(
        competitive_dense_block_input_forward,
        kernel_h=kernel_h, kernel_w=kernel_w, dilation=dilation,
        tile_n=128, tile_q=128, tile_k=128))
    out = fwd(params, x)
    jax.block_until_ready(out)
    assert out.shape == (B, C, H, W) and out.dtype == jnp.float32

    ref = reference_forward(params, x, kernel_h, kernel_w, dilation)
    np.testing.assert_allclose(np.asarray(out), np.asarray(ref), rtol=5e-2, atol=5e-2)
    print("KERNEL_OK")
</pallas_src>

<mosaic_0001>
module attributes {stable_mosaic.version = 11 : i64} {
  func.func @_conv_bn_prelu_kernel(%arg0: i32, %arg1: i32, %arg2: memref<1x72x128xbf16, #tpu.memory_space<vmem>>, %arg3: memref<32x72xbf16, #tpu.memory_space<vmem>>, %arg4: memref<32x1xf32, #tpu.memory_space<vmem>>, %arg5: memref<32x1xf32, #tpu.memory_space<vmem>>, %arg6: memref<1xf32, #tpu.memory_space<smem>>, %arg7: memref<1x32x128xbf16, #tpu.memory_space<vmem>>, %arg8: memref<1x32x128xbf16, #tpu.memory_space<vmem>>) attributes {dimension_semantics = [#tpu.dimension_semantics<parallel>, #tpu.dimension_semantics<parallel>], iteration_bounds = array<i64: 2, 2>, scalar_prefetch = 0 : i64, scratch_operands = 0 : i64, tpu.core_type = #tpu.core_type<tc>, window_params = [{transform_indices = @transform_0, window_bounds = array<i64: 1, 72, 128>}, {pipeline_mode = #tpu.pipeline_mode<synchronous>, transform_indices = @transform_1, window_bounds = array<i64: 32, 72>}, {pipeline_mode = #tpu.pipeline_mode<synchronous>, transform_indices = @transform_2, window_bounds = array<i64: 32, 1>}, {pipeline_mode = #tpu.pipeline_mode<synchronous>, transform_indices = @transform_3, window_bounds = array<i64: 32, 1>}, {transform_indices = @transform_4, window_bounds = array<i64: 1>}, {transform_indices = @transform_5, window_bounds = array<i64: 1, 32, 128>}, {transform_indices = @transform_6, window_bounds = array<i64: 1, 32, 128>}]} {
    %c0 = arith.constant 0 : index
    %c0_0 = arith.constant 0 : index
    %0 = vector.load %arg3[%c0, %c0_0] : memref<32x72xbf16, #tpu.memory_space<vmem>>, vector<32x72xbf16>
    %c0_1 = arith.constant 0 : index
    %c0_2 = arith.constant 0 : index
    %c0_3 = arith.constant 0 : index
    %1 = vector.load %arg2[%c0_1, %c0_2, %c0_3] : memref<1x72x128xbf16, #tpu.memory_space<vmem>>, vector<1x72x128xbf16>
    %2 = vector.shape_cast %1 : vector<1x72x128xbf16> to vector<72x128xbf16>
    %cst = arith.constant dense<0.000000e+00> : vector<32x128xf32>
    %3 = tpu.matmul %0, %2, %cst {dimension_numbers = #tpu.dot_dimension_numbers<[1], [0], [0], [1], [0, 0, 1, 1], [], []>} : vector<32x72xbf16>, vector<72x128xbf16>, vector<32x128xf32> -> vector<32x128xf32>
    %c0_4 = arith.constant 0 : index
    %c0_5 = arith.constant 0 : index
    %4 = vector.load %arg4[%c0_4, %c0_5] : memref<32x1xf32, #tpu.memory_space<vmem>>, vector<32x1xf32>
    %5 = vector.broadcast %4 : vector<32x1xf32> to vector<32x128xf32>
    %6 = arith.mulf %3, %5 : vector<32x128xf32>
    %c0_6 = arith.constant 0 : index
    %c0_7 = arith.constant 0 : index
    %7 = vector.load %arg5[%c0_6, %c0_7] : memref<32x1xf32, #tpu.memory_space<vmem>>, vector<32x1xf32>
    %8 = vector.broadcast %7 : vector<32x1xf32> to vector<32x128xf32>
    %9 = arith.addf %6, %8 : vector<32x128xf32>
    %10 = arith.truncf %9 : vector<32x128xf32> to vector<32x128xbf16>
    %c0_8 = arith.constant 0 : index
    %c0_9 = arith.constant 0 : index
    %c0_10 = arith.constant 0 : index
    %11 = vector.load %arg7[%c0_8, %c0_9, %c0_10] : memref<1x32x128xbf16, #tpu.memory_space<vmem>>, vector<1x32x128xbf16>
    %12 = vector.shape_cast %11 : vector<1x32x128xbf16> to vector<32x128xbf16>
    %13 = vector.shape_cast %10 : vector<32x128xbf16> to vector<1x32x128xbf16>
    tpu.vector_store %arg7[%c0_8, %c0_9, %c0_10], %13 {strides = array<i32>} : memref<1x32x128xbf16, #tpu.memory_space<vmem>>, vector<1x32x128xbf16>,
    %c0_11 = arith.constant 0 : index
    %14 = memref.load %arg6[%c0_11] : memref<1xf32, #tpu.memory_space<smem>>
    %cst_12 = arith.constant 0.000000e+00 : f32
    %15 = vector.broadcast %cst_12 : f32 to vector<32x128xf32>
    %16 = arith.cmpf oge, %9, %15 : vector<32x128xf32>
    %17 = vector.broadcast %14 : f32 to vector<32x128xf32>
    %18 = arith.mulf %17, %9 : vector<32x128xf32>
    %19 = arith.select %16, %9, %18 : vector<32x128xi1>, vector<32x128xf32>
    %20 = arith.truncf %19 : vector<32x128xf32> to vector<32x128xbf16>
    %c0_13 = arith.constant 0 : index
    %c0_14 = arith.constant 0 : index
    %c0_15 = arith.constant 0 : index
    %21 = vector.load %arg8[%c0_13, %c0_14, %c0_15] : memref<1x32x128xbf16, #tpu.memory_space<vmem>>, vector<1x32x128xbf16>
    %22 = vector.shape_cast %21 : vector<1x32x128xbf16> to vector<32x128xbf16>
    %23 = vector.shape_cast %20 : vector<32x128xbf16> to vector<1x32x128xbf16>
    tpu.vector_store %arg8[%c0_13, %c0_14, %c0_15], %23 {strides = array<i32>} : memref<1x32x128xbf16, #tpu.memory_space<vmem>>, vector<1x32x128xbf16>,
    return
  }
  func.func @transform_0(%arg0: i32, %arg1: i32) -> (i32, i32, i32) {
    %c0_i32 = arith.constant 0 : i32
    %c0_i32_0 = arith.constant 0 : i32
    return %arg0, %c0_i32, %arg1 : i32, i32, i32
  }
  func.func @transform_1(%arg0: i32, %arg1: i32) -> (i32, i32) {
    %c0_i32 = arith.constant 0 : i32
    %c0_i32_0 = arith.constant 0 : i32
    %c0_i32_1 = arith.constant 0 : i32
    return %c0_i32, %c0_i32_0 : i32, i32
  }
  func.func @transform_2(%arg0: i32, %arg1: i32) -> (i32, i32) {
    %c0_i32 = arith.constant 0 : i32
    %c0_i32_0 = arith.constant 0 : i32
    %c0_i32_1 = arith.constant 0 : i32
    return %c0_i32, %c0_i32_0 : i32, i32
  }
  func.func @transform_3(%arg0: i32, %arg1: i32) -> (i32, i32) {
    %c0_i32 = arith.constant 0 : i32
    %c0_i32_0 = arith.constant 0 : i32
    %c0_i32_1 = arith.constant 0 : i32
    return %c0_i32, %c0_i32_0 : i32, i32
  }
  func.func @transform_4(%arg0: i32, %arg1: i32) -> i32 {
    %c0_i32 = arith.constant 0 : i32
    %c0_i32_0 = arith.constant 0 : i32
    return %c0_i32 : i32
  }
  func.func @transform_5(%arg0: i32, %arg1: i32) -> (i32, i32, i32) {
    %c0_i32 = arith.constant 0 : i32
    %c0_i32_0 = arith.constant 0 : i32
    return %arg0, %c0_i32, %arg1 : i32, i32, i32
  }
  func.func @transform_6(%arg0: i32, %arg1: i32) -> (i32, i32, i32) {
    %c0_i32 = arith.constant 0 : i32
    %c0_i32_0 = arith.constant 0 : i32
    return %arg0, %c0_i32, %arg1 : i32, i32, i32
  }
}

module attributes {stable_mosaic.version = 11 : i64} {
  func.func @_mid_block_kernel(%arg0: i32, %arg1: i32, %arg2: memref<1x288x128xbf16, #tpu.memory_space<vmem>>, %arg3: memref<1x32x128xbf16, #tpu.memory_space<vmem>>, %arg4: memref<32x288xbf16, #tpu.memory_space<vmem>>, %arg5: memref<32x1xf32, #tpu.memory_space<vmem>>, %arg6: memref<32x1xf32, #tpu.memory_space<vmem>>, %arg7: memref<32x32xbf16, #tpu.memory_space<vmem>>, %arg8: memref<32x1xf32, #tpu.memory_space<vmem>>, %arg9: memref<32x1xf32, #tpu.memory_space<vmem>>, %arg10: memref<4x32xf32, #tpu.memory_space<vmem>>, %arg11: memref<4x1xf32, #tpu.memory_space<vmem>>, %arg12: memref<4x32xf32, #tpu.memory_space<vmem>>, %arg13: memref<4x1xf32, #tpu.memory_space<vmem>>, %arg14: memref<32x32xbf16, #tpu.memory_space<vmem>>, %arg15: memref<32x1xf32, #tpu.memory_space<vmem>>, %arg16: memref<1xf32, #tpu.memory_space<smem>>, %arg17: memref<1x32x128xbf16, #tpu.memory_space<vmem>>, %arg18: memref<1x4x128xf32, #tpu.memory_space<vmem>>, %arg19: memref<1x4x128xf32, #tpu.memory_space<vmem>>, %arg20: memref<1x32x128xbf16, #tpu.memory_space<vmem>>) attributes {dimension_semantics = [#tpu.dimension_semantics<parallel>, #tpu.dimension_semantics<parallel>], iteration_bounds = array<i64: 2, 2>, scalar_prefetch = 0 : i64, scratch_operands = 0 : i64, tpu.core_type = #tpu.core_type<tc>, window_params = [{transform_indices = @transform_0, window_bounds = array<i64: 1, 288, 128>}, {transform_indices = @transform_1, window_bounds = array<i64: 1, 32, 128>}, {pipeline_mode = #tpu.pipeline_mode<synchronous>, transform_indices = @transform_2, window_bounds = array<i64: 32, 288>}, {pipeline_mode = #tpu.pipeline_mode<synchronous>, transform_indices = @transform_3, window_bounds = array<i64: 32, 1>}, {pipeline_mode = #tpu.pipeline_mode<synchronous>, transform_indices = @transform_4, window_bounds = array<i64: 32, 1>}, {pipeline_mode = #tpu.pipeline_mode<synchronous>, transform_indices = @transform_5, window_bounds = array<i64: 32, 32>}, {pipeline_mode = #tpu.pipeline_mode<synchronous>, transform_indices = @transform_6, window_bounds = array<i64: 32, 1>}, {pipeline_mode = #tpu.pipeline_mode<synchronous>, transform_indices = @transform_7, window_bounds = array<i64: 32, 1>}, {pipeline_mode = #tpu.pipeline_mode<synchronous>, transform_indices = @transform_8, window_bounds = array<i64: 4, 32>}, {pipeline_mode = #tpu.pipeline_mode<synchronous>, transform_indices = @transform_9, window_bounds = array<i64: 4, 1>}, {pipeline_mode = #tpu.pipeline_mode<synchronous>, transform_indices = @transform_10, window_bounds = array<i64: 4, 32>}, {pipeline_mode = #tpu.pipeline_mode<synchronous>, transform_indices = @transform_11, window_bounds = array<i64: 4, 1>}, {pipeline_mode = #tpu.pipeline_mode<synchronous>, transform_indices = @transform_12, window_bounds = array<i64: 32, 32>}, {pipeline_mode = #tpu.pipeline_mode<synchronous>, transform_indices = @transform_13, window_bounds = array<i64: 32, 1>}, {transform_indices = @transform_14, window_bounds = array<i64: 1>}, {transform_indices = @transform_15, window_bounds = array<i64: 1, 32, 128>}, {transform_indices = @transform_16, window_bounds = array<i64: 1, 4, 128>}, {transform_indices = @transform_17, window_bounds = array<i64: 1, 4, 128>}, {transform_indices = @transform_18, window_bounds = array<i64: 1, 32, 128>}]} {
    %c0 = arith.constant 0 : index
    %0 = memref.load %arg16[%c0] : memref<1xf32, #tpu.memory_space<smem>>
    %c0_0 = arith.constant 0 : index
    %c0_1 = arith.constant 0 : index
    %1 = vector.load %arg4[%c0_0, %c0_1] : memref<32x288xbf16, #tpu.memory_space<vmem>>, vector<32x288xbf16>
    %c0_2 = arith.constant 0 : index
    %c0_3 = arith.constant 0 : index
    %c0_4 = arith.constant 0 : index
    %2 = vector.load %arg2[%c0_2, %c0_3, %c0_4] : memref<1x288x128xbf16, #tpu.memory_space<vmem>>, vector<1x288x128xbf16>
    %3 = vector.shape_cast %2 : vector<1x288x128xbf16> to vector<288x128xbf16>
    %cst = arith.constant dense<0.000000e+00> : vector<32x128xf32>
    %4 = tpu.matmul %1, %3, %cst {dimension_numbers = #tpu.dot_dimension_numbers<[1], [0], [0], [1], [0, 0, 1, 1], [], []>} : vector<32x288xbf16>, vector<288x128xbf16>, vector<32x128xf32> -> vector<32x128xf32>
    %c0_5 = arith.constant 0 : index
    %c0_6 = arith.constant 0 : index
    %5 = vector.load %arg5[%c0_5, %c0_6] : memref<32x1xf32, #tpu.memory_space<vmem>>, vector<32x1xf32>
    %6 = vector.broadcast %5 : vector<32x1xf32> to vector<32x128xf32>
    %7 = arith.mulf %4, %6 : vector<32x128xf32>
    %c0_7 = arith.constant 0 : index
    %c0_8 = arith.constant 0 : index
    %8 = vector.load %arg6[%c0_7, %c0_8] : memref<32x1xf32, #tpu.memory_space<vmem>>, vector<32x1xf32>
    %9 = vector.broadcast %8 : vector<32x1xf32> to vector<32x128xf32>
    %10 = arith.addf %7, %9 : vector<32x128xf32>
    %c0_9 = arith.constant 0 : index
    %c0_10 = arith.constant 0 : index
    %c0_11 = arith.constant 0 : index
    %11 = vector.load %arg3[%c0_9, %c0_10, %c0_11] : memref<1x32x128xbf16, #tpu.memory_space<vmem>>, vector<1x32x128xbf16>
    %12 = vector.shape_cast %11 : vector<1x32x128xbf16> to vector<32x128xbf16>
    %13 = arith.extf %12 : vector<32x128xbf16> to vector<32x128xf32>
    %14 = arith.maximumf %10, %13 : vector<32x128xf32>
    %cst_12 = arith.constant 0.000000e+00 : f32
    %15 = vector.broadcast %cst_12 : f32 to vector<32x128xf32>
    %16 = arith.cmpf oge, %14, %15 : vector<32x128xf32>
    %17 = vector.broadcast %0 : f32 to vector<32x128xf32>
    %18 = arith.mulf %17, %14 : vector<32x128xf32>
    %19 = arith.select %16, %14, %18 : vector<32x128xi1>, vector<32x128xf32>
    %20 = arith.truncf %19 : vector<32x128xf32> to vector<32x128xbf16>
    %c0_13 = arith.constant 0 : index
    %c0_14 = arith.constant 0 : index
    %21 = vector.load %arg7[%c0_13, %c0_14] : memref<32x32xbf16, #tpu.memory_space<vmem>>, vector<32x32xbf16>
    %cst_15 = arith.constant dense<0.000000e+00> : vector<32x128xf32>
    %22 = tpu.matmul %21, %20, %cst_15 {dimension_numbers = #tpu.dot_dimension_numbers<[1], [0], [0], [1], [0, 0, 1, 1], [], []>} : vector<32x32xbf16>, vector<32x128xbf16>, vector<32x128xf32> -> vector<32x128xf32>
    %c0_16 = arith.constant 0 : index
    %c0_17 = arith.constant 0 : index
    %23 = vector.load %arg8[%c0_16, %c0_17] : memref<32x1xf32, #tpu.memory_space<vmem>>, vector<32x1xf32>
    %24 = vector.broadcast %23 : vector<32x1xf32> to vector<32x128xf32>
    %25 = arith.mulf %22, %24 : vector<32x128xf32>
    %c0_18 = arith.constant 0 : index
    %c0_19 = arith.constant 0 : index
    %26 = vector.load %arg9[%c0_18, %c0_19] : memref<32x1xf32, #tpu.memory_space<vmem>>, vector<32x1xf32>
    %27 = vector.broadcast %26 : vector<32x1xf32> to vector<32x128xf32>
    %28 = arith.addf %25, %27 : vector<32x128xf32>
    %29 = arith.truncf %28 : vector<32x128xf32> to vector<32x128xbf16>
    %c0_20 = arith.constant 0 : index
    %c0_21 = arith.constant 0 : index
    %c0_22 = arith.constant 0 : index
    %30 = vector.load %arg17[%c0_20, %c0_21, %c0_22] : memref<1x32x128xbf16, #tpu.memory_space<vmem>>, vector<1x32x128xbf16>
    %31 = vector.shape_cast %30 : vector<1x32x128xbf16> to vector<32x128xbf16>
    %32 = vector.shape_cast %29 : vector<32x128xbf16> to vector<1x32x128xbf16>
    tpu.vector_store %arg17[%c0_20, %c0_21, %c0_22], %32 {strides = array<i32>} : memref<1x32x128xbf16, #tpu.memory_space<vmem>>, vector<1x32x128xbf16>,
    %c0_23 = arith.constant 0 : index
    %c0_24 = arith.constant 0 : index
    %33 = vector.load %arg10[%c0_23, %c0_24] : memref<4x32xf32, #tpu.memory_space<vmem>>, vector<4x32xf32>
    %cst_25 = arith.constant dense<0.000000e+00> : vector<4x128xf32>
    %34 = tpu.matmul %33, %28, %cst_25 {dimension_numbers = #tpu.dot_dimension_numbers<[1], [0], [0], [1], [0, 0, 1, 1], [], []>} : vector<4x32xf32>, vector<32x128xf32>, vector<4x128xf32> -> vector<4x128xf32>
    %c0_26 = arith.constant 0 : index
    %c0_27 = arith.constant 0 : index
    %35 = vector.load %arg11[%c0_26, %c0_27] : memref<4x1xf32, #tpu.memory_space<vmem>>, vector<4x1xf32>
    %36 = vector.broadcast %35 : vector<4x1xf32> to vector<4x128xf32>
    %37 = arith.addf %34, %36 : vector<4x128xf32>
    %c0_28 = arith.constant 0 : index
    %c0_29 = arith.constant 0 : index
    %38 = vector.load %arg12[%c0_28, %c0_29] : memref<4x32xf32, #tpu.memory_space<vmem>>, vector<4x32xf32>
    %cst_30 = arith.constant dense<0.000000e+00> : vector<4x128xf32>
    %39 = tpu.matmul %38, %28, %cst_30 {dimension_numbers = #tpu.dot_dimension_numbers<[1], [0], [0], [1], [0, 0, 1, 1], [], []>} : vector<4x32xf32>, vector<32x128xf32>, vector<4x128xf32> -> vector<4x128xf32>
    %c0_31 = arith.constant 0 : index
    %c0_32 = arith.constant 0 : index
    %40 = vector.load %arg13[%c0_31, %c0_32] : memref<4x1xf32, #tpu.memory_space<vmem>>, vector<4x1xf32>
    %41 = vector.broadcast %40 : vector<4x1xf32> to vector<4x128xf32>
    %42 = arith.addf %39, %41 : vector<4x128xf32>
    %c0_33 = arith.constant 0 : index
    %c0_34 = arith.constant 0 : index
    %43 = vector.load %arg14[%c0_33, %c0_34] : memref<32x32xbf16, #tpu.memory_space<vmem>>, vector<32x32xbf16>
    %cst_35 = arith.constant dense<0.000000e+00> : vector<32x128xf32>
    %44 = tpu.matmul %43, %29, %cst_35 {dimension_numbers = #tpu.dot_dimension_numbers<[1], [0], [0], [1], [0, 0, 1, 1], [], []>} : vector<32x32xbf16>, vector<32x128xbf16>, vector<32x128xf32> -> vector<32x128xf32>
    %c0_36 = arith.constant 0 : index
    %c0_37 = arith.constant 0 : index
    %45 = vector.load %arg15[%c0_36, %c0_37] : memref<32x1xf32, #tpu.memory_space<vmem>>, vector<32x1xf32>
    %46 = vector.broadcast %45 : vector<32x1xf32> to vector<32x128xf32>
    %47 = arith.addf %44, %46 : vector<32x128xf32>
    %c0_38 = arith.constant 0 : index
    %c0_39 = arith.constant 0 : index
    %c0_40 = arith.constant 0 : index
    %48 = vector.load %arg18[%c0_38, %c0_39, %c0_40] : memref<1x4x128xf32, #tpu.memory_space<vmem>>, vector<1x4x128xf32>
    %49 = vector.shape_cast %48 : vector<1x4x128xf32> to vector<4x128xf32>
    %50 = vector.shape_cast %37 : vector<4x128xf32> to vector<1x4x128xf32>
    tpu.vector_store %arg18[%c0_38, %c0_39, %c0_40], %50 {strides = array<i32>} : memref<1x4x128xf32, #tpu.memory_space<vmem>>, vector<1x4x128xf32>,
    %c0_41 = arith.constant 0 : index
    %c0_42 = arith.constant 0 : index
    %c0_43 = arith.constant 0 : index
    %51 = vector.load %arg19[%c0_41, %c0_42, %c0_43] : memref<1x4x128xf32, #tpu.memory_space<vmem>>, vector<1x4x128xf32>
    %52 = vector.shape_cast %51 : vector<1x4x128xf32> to vector<4x128xf32>
    %53 = vector.shape_cast %42 : vector<4x128xf32> to vector<1x4x128xf32>
    tpu.vector_store %arg19[%c0_41, %c0_42, %c0_43], %53 {strides = array<i32>} : memref<1x4x128xf32, #tpu.memory_space<vmem>>, vector<1x4x128xf32>,
    %54 = arith.truncf %47 : vector<32x128xf32> to vector<32x128xbf16>
    %c0_44 = arith.constant 0 : index
    %c0_45 = arith.constant 0 : index
    %c0_46 = arith.constant 0 : index
    %55 = vector.load %arg20[%c0_44, %c0_45, %c0_46] : memref<1x32x128xbf16, #tpu.memory_space<vmem>>, vector<1x32x128xbf16>
    %56 = vector.shape_cast %55 : vector<1x32x128xbf16> to vector<32x128xbf16>
    %57 = vector.shape_cast %54 : vector<32x128xbf16> to vector<1x32x128xbf16>
    tpu.vector_store %arg20[%c0_44, %c0_45, %c0_46], %57 {strides = array<i32>} : memref<1x32x128xbf16, #tpu.memory_space<vmem>>, vector<1x32x128xbf16>,
    return
  }
  func.func @transform_0(%arg0: i32, %arg1: i32) -> (i32, i32, i32) {
    %c0_i32 = arith.constant 0 : i32
    %c0_i32_0 = arith.constant 0 : i32
    return %arg0, %c0_i32, %arg1 : i32, i32, i32
  }
  func.func @transform_1(%arg0: i32, %arg1: i32) -> (i32, i32, i32) {
    %c0_i32 = arith.constant 0 : i32
    %c0_i32_0 = arith.constant 0 : i32
    return %arg0, %c0_i32, %arg1 : i32, i32, i32
  }
  func.func @transform_2(%arg0: i32, %arg1: i32) -> (i32, i32) {
    %c0_i32 = arith.constant 0 : i32
    %c0_i32_0 = arith.constant 0 : i32
    %c0_i32_1 = arith.constant 0 : i32
    return %c0_i32, %c0_i32_0 : i32, i32
  }
  func.func @transform_3(%arg0: i32, %arg1: i32) -> (i32, i32) {
    %c0_i32 = arith.constant 0 : i32
    %c0_i32_0 = arith.constant 0 : i32
    %c0_i32_1 = arith.constant 0 : i32
    return %c0_i32, %c0_i32_0 : i32, i32
  }
  func.func @transform_4(%arg0: i32, %arg1: i32) -> (i32, i32) {
    %c0_i32 = arith.constant 0 : i32
    %c0_i32_0 = arith.constant 0 : i32
    %c0_i32_1 = arith.constant 0 : i32
    return %c0_i32, %c0_i32_0 : i32, i32
  }
  func.func @transform_5(%arg0: i32, %arg1: i32) -> (i32, i32) {
    %c0_i32 = arith.constant 0 : i32
    %c0_i32_0 = arith.constant 0 : i32
    %c0_i32_1 = arith.constant 0 : i32
    return %c0_i32, %c0_i32_0 : i32, i32
  }
  func.func @transform_6(%arg0: i32, %arg1: i32) -> (i32, i32) {
    %c0_i32 = arith.constant 0 : i32
    %c0_i32_0 = arith.constant 0 : i32
    %c0_i32_1 = arith.constant 0 : i32
    return %c0_i32, %c0_i32_0 : i32, i32
  }
  func.func @transform_7(%arg0: i32, %arg1: i32) -> (i32, i32) {
    %c0_i32 = arith.constant 0 : i32
    %c0_i32_0 = arith.constant 0 : i32
    %c0_i32_1 = arith.constant 0 : i32
    return %c0_i32, %c0_i32_0 : i32, i32
  }
  func.func @transform_8(%arg0: i32, %arg1: i32) -> (i32, i32) {
    %c0_i32 = arith.constant 0 : i32
    %c0_i32_0 = arith.constant 0 : i32
    %c0_i32_1 = arith.constant 0 : i32
    return %c0_i32, %c0_i32_0 : i32, i32
  }
  func.func @transform_9(%arg0: i32, %arg1: i32) -> (i32, i32) {
    %c0_i32 = arith.constant 0 : i32
    %c0_i32_0 = arith.constant 0 : i32
    %c0_i32_1 = arith.constant 0 : i32
    return %c0_i32, %c0_i32_0 : i32, i32
  }
  func.func @transform_10(%arg0: i32, %arg1: i32) -> (i32, i32) {
    %c0_i32 = arith.constant 0 : i32
    %c0_i32_0 = arith.constant 0 : i32
    %c0_i32_1 = arith.constant 0 : i32
    return %c0_i32, %c0_i32_0 : i32, i32
  }
  func.func @transform_11(%arg0: i32, %arg1: i32) -> (i32, i32) {
    %c0_i32 = arith.constant 0 : i32
    %c0_i32_0 = arith.constant 0 : i32
    %c0_i32_1 = arith.constant 0 : i32
    return %c0_i32, %c0_i32_0 : i32, i32
  }
  func.func @transform_12(%arg0: i32, %arg1: i32) -> (i32, i32) {
    %c0_i32 = arith.constant 0 : i32
    %c0_i32_0 = arith.constant 0 : i32
    %c0_i32_1 = arith.constant 0 : i32
    return %c0_i32, %c0_i32_0 : i32, i32
  }
  func.func @transform_13(%arg0: i32, %arg1: i32) -> (i32, i32) {
    %c0_i32 = arith.constant 0 : i32
    %c0_i32_0 = arith.constant 0 : i32
    %c0_i32_1 = arith.constant 0 : i32
    return %c0_i32, %c0_i32_0 : i32, i32
  }
  func.func @transform_14(%arg0: i32, %arg1: i32) -> i32 {
    %c0_i32 = arith.constant 0 : i32
    %c0_i32_0 = arith.constant 0 : i32
    return %c0_i32 : i32
  }
  func.func @transform_15(%arg0: i32, %arg1: i32) -> (i32, i32, i32) {
    %c0_i32 = arith.constant 0 : i32
    %c0_i32_0 = arith.constant 0 : i32
    return %arg0, %c0_i32, %arg1 : i32, i32, i32
  }
  func.func @transform_16(%arg0: i32, %arg1: i32) -> (i32, i32, i32) {
    %c0_i32 = arith.constant 0 : i32
    %c0_i32_0 = arith.constant 0 : i32
    return %arg0, %c0_i32, %arg1 : i32, i32, i32
  }
  func.func @transform_17(%arg0: i32, %arg1: i32) -> (i32, i32, i32) {
    %c0_i32 = arith.constant 0 : i32
    %c0_i32_0 = arith.constant 0 : i32
    return %arg0, %c0_i32, %arg1 : i32, i32, i32
  }
  func.func @transform_18(%arg0: i32, %arg1: i32) -> (i32, i32, i32) {
    %c0_i32 = arith.constant 0 : i32
    %c0_i32_0 = arith.constant 0 : i32
    return %arg0, %c0_i32, %arg1 : i32, i32, i32
  }
}

module attributes {stable_mosaic.version = 11 : i64} {
  func.func @_attn_bn_kernel(%arg0: i32, %arg1: i32, %arg2: i32, %arg3: memref<1x4x128xf32, #tpu.memory_space<vmem>>, %arg4: memref<1x4x128xf32, #tpu.memory_space<vmem>>, %arg5: memref<1x32x128xbf16, #tpu.memory_space<vmem>>, %arg6: memref<1x32x128xbf16, #tpu.memory_space<vmem>>, %arg7: memref<32x1xf32, #tpu.memory_space<vmem>>, %arg8: memref<32x1xf32, #tpu.memory_space<vmem>>, %arg9: memref<1xf32, #tpu.memory_space<smem>>, %arg10: memref<1x32x128xf32, #tpu.memory_space<vmem>>, %arg11: memref<1x128xf32, #tpu.memory_space<vmem>>, %arg12: memref<1x128xf32, #tpu.memory_space<vmem>>, %arg13: memref<32x128xf32, #tpu.memory_space<vmem>>) attributes {dimension_semantics = [#tpu.dimension_semantics<parallel>, #tpu.dimension_semantics<parallel>, #tpu.dimension_semantics<arbitrary>], iteration_bounds = array<i64: 2, 2, 2>, scalar_prefetch = 0 : i64, scratch_operands = 3 : i64, tpu.core_type = #tpu.core_type<tc>, window_params = [{transform_indices = @transform_0, window_bounds = array<i64: 1, 4, 128>}, {transform_indices = @transform_1, window_bounds = array<i64: 1, 4, 128>}, {transform_indices = @transform_2, window_bounds = array<i64: 1, 32, 128>}, {transform_indices = @transform_3, window_bounds = array<i64: 1, 32, 128>}, {pipeline_mode = #tpu.pipeline_mode<synchronous>, transform_indices = @transform_4, window_bounds = array<i64: 32, 1>}, {pipeline_mode = #tpu.pipeline_mode<synchronous>, transform_indices = @transform_5, window_bounds = array<i64: 32, 1>}, {transform_indices = @transform_6, window_bounds = array<i64: 1>}, {transform_indices = @transform_7, window_bounds = array<i64: 1, 32, 128>}]} {
    %c0_i32 = arith.constant 0 : i32
    %0 = arith.cmpi eq, %arg2, %c0_i32 : i32
    %1 = arith.extui %0 : i1 to i32
    %c0_i32_0 = arith.constant 0 : i32
    %2 = arith.cmpi ne, %1, %c0_i32_0 : i32
    scf.if %2 {
      %cst_25 = arith.constant 0xFF800000 : f32
      %36 = vector.broadcast %cst_25 : f32 to vector<1x128xf32>
      %c0_26 = arith.constant 0 : index
      %c0_27 = arith.constant 0 : index
      %37 = vector.load %arg11[%c0_26, %c0_27] : memref<1x128xf32, #tpu.memory_space<vmem>>, vector<1x128xf32>
      tpu.vector_store %arg11[%c0_26, %c0_27], %36 {strides = array<i32>} : memref<1x128xf32, #tpu.memory_space<vmem>>, vector<1x128xf32>,
      %cst_28 = arith.constant 0.000000e+00 : f32
      %38 = vector.broadcast %cst_28 : f32 to vector<1x128xf32>
      %c0_29 = arith.constant 0 : index
      %c0_30 = arith.constant 0 : index
      %39 = vector.load %arg12[%c0_29, %c0_30] : memref<1x128xf32, #tpu.memory_space<vmem>>, vector<1x128xf32>
      tpu.vector_store %arg12[%c0_29, %c0_30], %38 {strides = array<i32>} : memref<1x128xf32, #tpu.memory_space<vmem>>, vector<1x128xf32>,
      %cst_31 = arith.constant 0.000000e+00 : f32
      %40 = vector.broadcast %cst_31 : f32 to vector<32x128xf32>
      %c0_32 = arith.constant 0 : index
      %c0_33 = arith.constant 0 : index
      %41 = vector.load %arg13[%c0_32, %c0_33] : memref<32x128xf32, #tpu.memory_space<vmem>>, vector<32x128xf32>
      tpu.vector_store %arg13[%c0_32, %c0_33], %40 {strides = array<i32>} : memref<32x128xf32, #tpu.memory_space<vmem>>, vector<32x128xf32>,
    } else {
    }
    %c0 = arith.constant 0 : index
    %c0_1 = arith.constant 0 : index
    %c0_2 = arith.constant 0 : index
    %3 = vector.load %arg3[%c0, %c0_1, %c0_2] : memref<1x4x128xf32, #tpu.memory_space<vmem>>, vector<1x4x128xf32>
    %4 = vector.shape_cast %3 : vector<1x4x128xf32> to vector<4x128xf32>
    %c0_3 = arith.constant 0 : index
    %c0_4 = arith.constant 0 : index
    %c0_5 = arith.constant 0 : index
    %5 = vector.load %arg4[%c0_3, %c0_4, %c0_5] : memref<1x4x128xf32, #tpu.memory_space<vmem>>, vector<1x4x128xf32>
    %6 = vector.shape_cast %5 : vector<1x4x128xf32> to vector<4x128xf32>
    %cst = arith.constant dense<0.000000e+00> : vector<128x128xf32>
    %7 = tpu.matmul %6, %4, %cst {dimension_numbers = #tpu.dot_dimension_numbers<[0], [0], [1], [1], [0, 1, 1, 1], [], []>} : vector<4x128xf32>, vector<4x128xf32>, vector<128x128xf32> -> vector<128x128xf32>
    %c0_6 = arith.constant 0 : index
    %c0_7 = arith.constant 0 : index
    %8 = vector.load %arg11[%c0_6, %c0_7] : memref<1x128xf32, #tpu.memory_space<vmem>>, vector<1x128xf32>
    %cst_8 = arith.constant dense<0xFF800000> : vector<128xf32>
    %9 = vector.multi_reduction <maximumf>, %7, %cst_8 [0] : vector<128x128xf32> to vector<128xf32>
    %10 = vector.shape_cast %9 : vector<128xf32> to vector<1x128xf32>
    %11 = arith.maximumf %8, %10 : vector<1x128xf32>
    %12 = arith.subf %8, %11 : vector<1x128xf32>
    %13 = math.exp %12 : vector<1x128xf32>
    %14 = vector.broadcast %11 : vector<1x128xf32> to vector<128x128xf32>
    %15 = arith.subf %7, %14 : vector<128x128xf32>
    %16 = math.exp %15 : vector<128x128xf32>
    %c0_9 = arith.constant 0 : index
    %c0_10 = arith.constant 0 : index
    %17 = vector.load %arg12[%c0_9, %c0_10] : memref<1x128xf32, #tpu.memory_space<vmem>>, vector<1x128xf32>
    %18 = arith.mulf %13, %17 : vector<1x128xf32>
    %cst_11 = arith.constant dense<0.000000e+00> : vector<128xf32>
    %19 = vector.multi_reduction <add>, %16, %cst_11 [0] : vector<128x128xf32> to vector<128xf32>
    %20 = vector.shape_cast %19 : vector<128xf32> to vector<1x128xf32>
    %21 = arith.addf %18, %20 : vector<1x128xf32>
    %c0_12 = arith.constant 0 : index
    %c0_13 = arith.constant 0 : index
    %22 = vector.load %arg12[%c0_12, %c0_13] : memref<1x128xf32, #tpu.memory_space<vmem>>, vector<1x128xf32>
    tpu.vector_store %arg12[%c0_12, %c0_13], %21 {strides = array<i32>} : memref<1x128xf32, #tpu.memory_space<vmem>>, vector<1x128xf32>,
    %c0_14 = arith.constant 0 : index
    %c0_15 = arith.constant 0 : index
    %23 = vector.load %arg13[%c0_14, %c0_15] : memref<32x128xf32, #tpu.memory_space<vmem>>, vector<32x128xf32>
    %24 = vector.broadcast %13 : vector<1x128xf32> to vector<32x128xf32>
    %25 = arith.mulf %24, %23 : vector<32x128xf32>
    %c0_16 = arith.constant 0 : index
    %c0_17 = arith.constant 0 : index
    %c0_18 = arith.constant 0 : index
    %26 = vector.load %arg5[%c0_16, %c0_17, %c0_18] : memref<1x32x128xbf16, #tpu.memory_space<vmem>>, vector<1x32x128xbf16>
    %27 = vector.shape_cast %26 : vector<1x32x128xbf16> to vector<32x128xbf16>
    %28 = arith.truncf %16 : vector<128x128xf32> to vector<128x128xbf16>
    %cst_19 = arith.constant dense<0.000000e+00> : vector<32x128xf32>
    %29 = tpu.matmul %27, %28, %cst_19 {dimension_numbers = #tpu.dot_dimension_numbers<[1], [0], [0], [1], [0, 0, 1, 1], [], []>} : vector<32x128xbf16>, vector<128x128xbf16>, vector<32x128xf32> -> vector<32x128xf32>
    %30 = arith.addf %25, %29 : vector<32x128xf32>
    %c0_20 = arith.constant 0 : index
    %c0_21 = arith.constant 0 : index
    %31 = vector.load %arg13[%c0_20, %c0_21] : memref<32x128xf32, #tpu.memory_space<vmem>>, vector<32x128xf32>
    tpu.vector_store %arg13[%c0_20, %c0_21], %30 {strides = array<i32>} : memref<32x128xf32, #tpu.memory_space<vmem>>, vector<32x128xf32>,
    %c0_22 = arith.constant 0 : index
    %c0_23 = arith.constant 0 : index
    %32 = vector.load %arg11[%c0_22, %c0_23] : memref<1x128xf32, #tpu.memory_space<vmem>>, vector<1x128xf32>
    tpu.vector_store %arg11[%c0_22, %c0_23], %11 {strides = array<i32>} : memref<1x128xf32, #tpu.memory_space<vmem>>, vector<1x128xf32>,
    %c1_i32 = arith.constant 1 : i32
    %33 = arith.cmpi eq, %arg2, %c1_i32 : i32
    %34 = arith.extui %33 : i1 to i32
    %c0_i32_24 = arith.constant 0 : i32
    %35 = arith.cmpi ne, %34, %c0_i32_24 : i32
    scf.if %35 {
      %c0_25 = arith.constant 0 : index
      %c0_26 = arith.constant 0 : index
      %36 = vector.load %arg13[%c0_25, %c0_26] : memref<32x128xf32, #tpu.memory_space<vmem>>, vector<32x128xf32>
      %c0_27 = arith.constant 0 : index
      %c0_28 = arith.constant 0 : index
      %37 = vector.load %arg12[%c0_27, %c0_28] : memref<1x128xf32, #tpu.memory_space<vmem>>, vector<1x128xf32>
      %38 = tpu.reciprocal %37 {approx = true} : vector<1x128xf32> -> vector<1x128xf32>
      %39 = vector.broadcast %38 : vector<1x128xf32> to vector<32x128xf32>
      %40 = arith.mulf %36, %39 : vector<32x128xf32>
      %c0_29 = arith.constant 0 : index
      %41 = memref.load %arg9[%c0_29] : memref<1xf32, #tpu.memory_space<smem>>
      %42 = vector.broadcast %41 : f32 to vector<32x128xf32>
      %43 = arith.mulf %42, %40 : vector<32x128xf32>
      %c0_30 = arith.constant 0 : index
      %c0_31 = arith.constant 0 : index
      %c0_32 = arith.constant 0 : index
      %44 = vector.load %arg6[%c0_30, %c0_31, %c0_32] : memref<1x32x128xbf16, #tpu.memory_space<vmem>>, vector<1x32x128xbf16>
      %45 = vector.shape_cast %44 : vector<1x32x128xbf16> to vector<32x128xbf16>
      %46 = arith.extf %45 : vector<32x128xbf16> to vector<32x128xf32>
      %47 = arith.addf %43, %46 : vector<32x128xf32>
      %c0_33 = arith.constant 0 : index
      %c0_34 = arith.constant 0 : index
      %48 = vector.load %arg7[%c0_33, %c0_34] : memref<32x1xf32, #tpu.memory_space<vmem>>, vector<32x1xf32>
      %49 = vector.broadcast %48 : vector<32x1xf32> to vector<32x128xf32>
      %50 = arith.mulf %47, %49 : vector<32x128xf32>
      %c0_35 = arith.constant 0 : index
      %c0_36 = arith.constant 0 : index
      %51 = vector.load %arg8[%c0_35, %c0_36] : memref<32x1xf32, #tpu.memory_space<vmem>>, vector<32x1xf32>
      %52 = vector.broadcast %51 : vector<32x1xf32> to vector<32x128xf32>
      %53 = arith.addf %50, %52 : vector<32x128xf32>
      %c0_37 = arith.constant 0 : index
      %c0_38 = arith.constant 0 : index
      %c0_39 = arith.constant 0 : index
      %54 = vector.load %arg10[%c0_37, %c0_38, %c0_39] : memref<1x32x128xf32, #tpu.memory_space<vmem>>, vector<1x32x128xf32>
      %55 = vector.shape_cast %54 : vector<1x32x128xf32> to vector<32x128xf32>
      %56 = vector.shape_cast %53 : vector<32x128xf32> to vector<1x32x128xf32>
      tpu.vector_store %arg10[%c0_37, %c0_38, %c0_39], %56 {strides = array<i32>} : memref<1x32x128xf32, #tpu.memory_space<vmem>>, vector<1x32x128xf32>,
    } else {
    }
    return
  }
  func.func @transform_0(%arg0: i32, %arg1: i32, %arg2: i32) -> (i32, i32, i32) {
    %c0_i32 = arith.constant 0 : i32
    %c0_i32_0 = arith.constant 0 : i32
    return %arg0, %c0_i32, %arg1 : i32, i32, i32
  }
  func.func @transform_1(%arg0: i32, %arg1: i32, %arg2: i32) -> (i32, i32, i32) {
    %c0_i32 = arith.constant 0 : i32
    %c0_i32_0 = arith.constant 0 : i32
    return %arg0, %c0_i32, %arg2 : i32, i32, i32
  }
  func.func @transform_2(%arg0: i32, %arg1: i32, %arg2: i32) -> (i32, i32, i32) {
    %c0_i32 = arith.constant 0 : i32
    %c0_i32_0 = arith.constant 0 : i32
    return %arg0, %c0_i32, %arg2 : i32, i32, i32
  }
  func.func @transform_3(%arg0: i32, %arg1: i32, %arg2: i32) -> (i32, i32, i32) {
    %c0_i32 = arith.constant 0 : i32
    %c0_i32_0 = arith.constant 0 : i32
    return %arg0, %c0_i32, %arg1 : i32, i32, i32
  }
  func.func @transform_4(%arg0: i32, %arg1: i32, %arg2: i32) -> (i32, i32) {
    %c0_i32 = arith.constant 0 : i32
    %c0_i32_0 = arith.constant 0 : i32
    %c0_i32_1 = arith.constant 0 : i32
    return %c0_i32, %c0_i32_0 : i32, i32
  }
  func.func @transform_5(%arg0: i32, %arg1: i32, %arg2: i32) -> (i32, i32) {
    %c0_i32 = arith.constant 0 : i32
    %c0_i32_0 = arith.constant 0 : i32
    %c0_i32_1 = arith.constant 0 : i32
    return %c0_i32, %c0_i32_0 : i32, i32
  }
  func.func @transform_6(%arg0: i32, %arg1: i32, %arg2: i32) -> i32 {
    %c0_i32 = arith.constant 0 : i32
    %c0_i32_0 = arith.constant 0 : i32
    return %c0_i32 : i32
  }
  func.func @transform_7(%arg0: i32, %arg1: i32, %arg2: i32) -> (i32, i32, i32) {
    %c0_i32 = arith.constant 0 : i32
    %c0_i32_0 = arith.constant 0 : i32
    return %arg0, %c0_i32, %arg1 : i32, i32, i32
  }
}

</mosaic_0001>

<bundles_post_ra>
// kernel: competitive_dense_block_input_forward.3
= control target key start
LH: loop header
LB: loop body
LE: loop exit
PB: predicated region body
PF: predicated region fallthrough
CT: control target
= control target key end

     0   :  { %s1182_s0 = inlined_call_operand.vmem [shape: bf16[2,72,256], index: 0, kind: input, shape index: {}]   ;;  %s1183_s1 = inlined_call_operand.vmem [shape: bf16[32,72], index: 1, kind: input, shape index: {}]   ;;  %s1184_s2 = inlined_call_operand.vmem [shape: f32[32,1], index: 2, kind: input, shape index: {}]   ;;  %s1185_s3 = inlined_call_operand.vmem [shape: f32[32,1], index: 3, kind: input, shape index: {}]   ;;  %s1186_s4 = inlined_call_operand.<no memory space> [shape: f32[1], index: 4, kind: input, shape index: {}]   ;;  %s1187_s5 = inlined_call_operand.vmem [shape: bf16[2,32,256], index: 5, kind: output, shape index: {0}]   ;;  %s1188_s6 = inlined_call_operand.vmem [shape: bf16[2,32,256], index: 6, kind: output, shape index: {1}]  }
   0x1   :  { %12 = sst [smem:[#allocation2]] %s1186_s4 }
   0x2   :  { %s1043_s23 = smov 0   ;;  %s1045_s24 = smov 0  }
   0x3   :  { %s1047_s25 = smov 0   ;;  %s1049_s26 = smov 0  }
   0x4   :  { %s1051_s27 = smov 0   ;;  %s1053_s28 = smov 0  }
   0x5   :  { %s1055_s29 = smov 0  }
   0x6 LB: > { %s27_s4 = sadd.s32 1, %s994_s27  ;;  %s30_s30 = sadd.s32 1, %s998_s28  ;;  %s1002_s29 = sphi %s1055_s29, %s18_s29   ;;  %s998_s28 = sphi %s1053_s28, %s1195_s28   ;;  %s994_s27 = sphi %s1051_s27, %s1194_s27   ;;  %s990_s26 = sphi %s1049_s26, %s1193_s26   ;;  %s986_s25 = sphi %s1047_s25, %s1192_s25   ;;  %s982_s24 = sphi %s1045_s24, %s1191_s24   ;;  %s978_s23 = sphi %s1043_s23, %s1190_s23  }
   0x7   : > { %p28_p0 = scmp.ge.s32.totalorder %s27_s4, 2  ;;  %s794_s7 = sadd.s32 4294967295, %s1002_s29  }
   0x8   : > { %p46_p1 = scmp.ne.s32.totalorder %s982_s24, %s978_s23  ;;  %p47_p2 = scmp.eq.s32.totalorder %s1002_s29, 0 }
   0x9   : > { %s1197_s4 = smov (%p28_p0, %s27_s4), 0  ;;  %s1199_s30 = smov (!%p28_p0, %s30_s30), %s998_s28 }
   0xa   : > { %p32_p3 = scmp.ge.s32.totalorder %s1199_s30, 2  ;;  %p162_p4 = scmp.eq.s32.totalorder %s794_s7, 3 }
   0xb   : > { %s35_s8 = ssub.s32 %s994_s27, %s1197_s4  ;;  %p48_p5 = por %p47_p2, %p46_p1 }
   0xc   : > { %s1201_s30 = smov (%p32_p3, %s1199_s30), 0  ;;  %p1091_p6 = por %p162_p4, %p46_p1 }
   0xd   : > { %s34_s10 = ssub.s32 %s998_s28, %s1201_s30  ;;  %s39_s12 = sadd.s32 1, %s982_s24 }
   0xe   : > { %s36_s11 = sor.u32 %s35_s8, %s34_s10  ;;  %p797_p8 = scmp.ge.s32.totalorder %s1002_s29, 4 }
   0xf   : > { %p37_p7 = scmp.eq.s32.totalorder %s36_s11, 0 }
  0x10   : > { %224 = sbr.rel (%p797_p8) target bundleno = 36 (0x24), region = 32 }
  0x11   : > { %s1099_s13 = scalar_select %p37_p7, %s982_s24, %s39_s12  }
  0x17   : > { %227 = sbr.rel (!%p48_p5) target bundleno = 36 (0x24), region = 36  ;;  %s229_s14 = sand.u32 (%p48_p5), 1, %s982_s24  }
  0x18   : > { %s880_s15 = smul.u32 (%p48_p5), 18, %s998_s28 }
  0x19   : > { %s879_s16 = smul.u32 (%p48_p5), 36, %s229_s14 }
  0x1a   : > { %s233_s17 = sadd.s32 (%p48_p5), %s994_s27, %s880_s15 }
  0x1b   : > { %s798_s18 = sshll.u32 (%p48_p5), %s233_s17, 2  ;;  %s231_s22 = scalar_lea.vmem (%p48_p5), [#allocation3], %s879_s16 }
  0x1c   : > { %s235_s21 = scalar_lea.vmem (%p48_p5), %s1182_s0, %s798_s18 }
  0x1d   : > { %v251_v0 = vld [vmem:[%s235_s21] sm:$0xf] (%p48_p5)  ;;  %v253_v1 = vld [vmem:[%s235_s21 + $0x8] sm:$0xf] (%p48_p5)  ;;  %v255_v2 = vld [vmem:[%s235_s21 + $0x10] sm:$0xf] (%p48_p5) }
  0x1e   : > { %252 = vst [vmem:[%s231_s22] sm:$0xf] %v251_v0  ;;  %254 = vst [vmem:[%s231_s22 + $0x4] sm:$0xf] %v253_v1  ;;  %v257_v3 = vld [vmem:[%s235_s21 + $0x18] sm:$0xf] }
  0x1f   : > { %256 = vst [vmem:[%s231_s22 + $0x8] sm:$0xf] %v255_v2  ;;  %v259_v4 = vld [vmem:[%s235_s21 + $0x20] sm:$0xf]  ;;  %v261_v5 = vld [vmem:[%s235_s21 + $0x28] sm:$0xf] }
  0x20   : > { %258 = vst [vmem:[%s231_s22 + $0xc] sm:$0xf] %v257_v3  ;;  %260 = vst [vmem:[%s231_s22 + $0x10] sm:$0xf] %v259_v4  ;;  %v263_v6 = vld [vmem:[%s235_s21 + $0x30] sm:$0xf] }
  0x21   : > { %262 = vst [vmem:[%s231_s22 + $0x14] sm:$0xf] %v261_v5  ;;  %v265_v7 = vld [vmem:[%s235_s21 + $0x38] sm:$0xf]  ;;  %v267_v8 = vld [vmem:[%s235_s21 + $0x40] sm:$0xf] }
  0x22   : > { %264 = vst [vmem:[%s231_s22 + $0x18] sm:$0xf] %v263_v6  ;;  %266 = vst [vmem:[%s231_s22 + $0x1c] sm:$0xf] %v265_v7 }
  0x23   : > { %268 = vst [vmem:[%s231_s22 + $0x20] sm:$0xf] %v267_v8 }
  0x24 PF: > { %p799_p9 = scmp.ge.s32.totalorder %s1002_s29, 1  ;;  %p308_p10 = scmp.lt.s32.totalorder %s1002_s29, 5 }
  0x26   : > { %p309_p11 = pnand %p799_p9, %p308_p10 }
  0x27   : > { %s315_s7 = sand.u32 (!%p309_p11), 1, %s978_s23   ;;  %v946_v9 = vld [vmem:[%s1183_s1] sm:$0xff] (!%p309_p11)   ;;  %vm398_vm0 = vcmask (!%p309_p11), 588800   ;;  %v460_v10 = vld [vmem:[%s1184_s2 + $0x10] sm:$0xff] (!%p309_p11)  ;;  %v1004_v12 = vmov (!%p309_p11), 0   ;;  %v461_v13 = vld [vmem:[%s1184_s2 + $0x18] sm:$0xff] (!%p309_p11) }
  0x28   : > { %312 = sbr.rel (%p309_p11) target bundleno = 305 (0x131), region = 77  ;;  %v458_v11 = vld [vmem:[%s1184_s2] sm:$0xff] (!%p309_p11)  ;;  %874 = vmatprep.mubr.msk.bf16.mxu0 (!%p309_p11), %vm398_vm0, %v946_v9  ;;  %940 = vset.pattern.permute.xlu1 (!%p309_p11), %v1004_v12  ;;  %v459_v16 = vld [vmem:[%s1184_s2 + $0x8] sm:$0xff] (!%p309_p11)  ;;  %v489_v21 = vld [vmem:[%s1185_s3 + $0x18] sm:$0xff] (!%p309_p11)  ;;  %vm405_vm1 = vcmask (!%p309_p11), 1043456   ;;  %s534_s20 = sld [smem:[#allocation2]] (!%p309_p11) }
  0x29   : > { %s881_s8 = smul.u32 (!%p309_p11), 36, %s315_s7  ;;  %939 = vset.pattern.permute.xlu0 (!%p309_p11), %v1004_v12  ;;  %474 = vperm.xlu1 (!%p309_p11), %940, %v460_v10   ;;  %v487_v18 = vld [vmem:[%s1185_s3 + $0x8] sm:$0xff] (!%p309_p11)  ;;  %v486_v19 = vld [vmem:[%s1185_s3] sm:$0xff] (!%p309_p11)  ;;  %v488_v22 = vld [vmem:[%s1185_s3 + $0x10] sm:$0xff] (!%p309_p11) }
  0x2a   : > { %464 = vperm.xlu0 (!%p309_p11), %939, %v458_v11   ;;  %v947_v25 = vld [vmem:[%s1183_s1 + $0x8] sm:$0xff] (!%p309_p11)  }
  0x2b   : > { %s317_s19 = scalar_lea.vmem (!%p309_p11), [#allocation3], %s881_s8 }
  0x2c   : > { %v941_v14 = vld [vmem:[%s317_s19] sm:$0xff] (!%p309_p11)   ;;  %v942_v15 = vld [vmem:[%s317_s19 + $0x8] sm:$0xff] (!%p309_p11)   ;;  %v943_v17 = vld [vmem:[%s317_s19 + $0x10] sm:$0xff] (!%p309_p11)  }
  0x2d   : > { %864 = vmatprep.subr.bf16.mxu0 (!%p309_p11), %v941_v14  ;;  %479 = vperm.xlu1 (!%p309_p11), %940, %v461_v13   ;;  %v944_v20 = vld [vmem:[%s317_s19 + $0x18] sm:$0xff] (!%p309_p11)   ;;  %v945_v23 = vld [vmem:[%s317_s19 + $0x20] ss:$0 sps:$4 sm:$0xff] (!%p309_p11)   ;;  %s800_s19 = sshll.u32 (!%p309_p11), %s315_s7, 4 }
  0x2e   : > { %865 = vmatpush3.bf16.msra.mxu0 (!%p309_p11), %v941_v14  ;;  %469 = vperm.xlu0 (!%p309_p11), %939, %v459_v16   ;;  %v407_v24 = vsel (!%p309_p11), %vm405_vm1, %v945_v23, 0  ;;  %v539_v36 = vstv (!%p309_p11), %s534_s20  ;;  %s340_s23 = scalar_lea.vmem (!%p309_p11), [#allocation4], %s800_s19  ;;  %s346_s7 = scalar_lea.vmem (!%p309_p11), [#allocation5], %s800_s19 }
  0x2f   : > { %866 = vmatprep.subr.bf16.mxu0 %v942_v15  ;;  %s821_s21 = sshll.u32 (%p1091_p6), %s990_s26, 3 }
  0x30   : > { %s580_s22 = sadd.s32 (%p1091_p6), %s986_s25, %s821_s21 }
  0x31   : > { %497 = vperm.xlu1 %940, %v487_v18   ;;  %s822_s10 = sshll.u32 (%p1091_p6), %s580_s22, 2 }
  0x32   : > { %867 = vmatpush3.bf16.msra.mxu0 %v942_v15  ;;  %492 = vperm.xlu0 %939, %v486_v19   ;;  %s582_s12 = scalar_lea.vmem (%p1091_p6), %s1187_s5, %s822_s10 }
  0x33   : > { %868 = vmatprep.subr.bf16.mxu0 %v943_v17 }
  0x35   : > { %507 = vperm.xlu1 %940, %v489_v21  }
  0x36   : > { %869 = vmatpush3.bf16.msra.mxu0 %v943_v17  ;;  %502 = vperm.xlu0 %939, %v488_v22  }
  0x37   : > { %870 = vmatprep.subr.bf16.mxu0 %v944_v20 }
  0x3a   : > { %871 = vmatpush3.bf16.msra.mxu0 %v944_v20 }
  0x3b   : > { %878 = vmatprep.subr.msk.bf16.mxu0 %vm405_vm1, %v945_v23 }
  0x3e   : > { %873 = vmatpush3.bf16.msra.mxu0 %v407_v24 }
  0x41   : > { %875 = vmatmul.mubr.msk.bf16.vlgmr.msra.gmra.mrb[0].mxu0 %vm398_vm0, %v947_v25 }
  0xa8   : > { %v475_v27 = vpop.permute.xlu1 %474 }
  0xa9   : > { %v465_v26 = vpop.permute.xlu0 %464 }
  0xac   : > { %v480_v29 = vpop.permute.xlu1 %479 }
  0xad   : > { %v470_v28 = vpop.permute.xlu0 %469 }
  0xb0   : > { %v498_v31 = vpop.permute.xlu1 %497 }
  0xb1   : > { %v493_v30 = vpop.permute.xlu0 %492 }
  0xb4   : > { %v508_v42 = vpop.permute.xlu1 %507 }
  0xb5   : > { %v503_v35 = vpop.permute.xlu0 %502 }
 0x114   : > { %v876_v32 = vpop.f32.mrb[0].mxu0 }
 0x115   : > { %v484_v33 = vmul.f32 %v876_v32, %v475_v27  ;;  %v443_v34 = vpop.f32.mrb[1].mxu0 }
 0x116   : > { %v482_v37 = vmul.f32 %v465_v26, %v443_v34  ;;  %v877_v38 = vpop.f32.mrb[2].mxu0 }
 0x117   : > { %v512_v39 = vadd.f32 %v503_v35, %v484_v33  ;;  %v485_v40 = vmul.f32 %v877_v38, %v480_v29  ;;  %v446_v41 = vpop.f32.mrb[3].mxu0 }
 0x118   : > { %v510_v43 = vadd.f32 %v493_v30, %v482_v37  ;;  %v483_v44 = vmul.f32 %v470_v28, %v446_v41 }
 0x119   : > { %v542_v45 = vmul.f32 %v539_v36, %v512_v39  ;;  %v513_v46 = vadd.f32 %v508_v42, %v485_v40  ;;  %vm537_vm2 = vcmp.ge.f32.partialorder %v512_v39, 0.0 }
 0x11a   : > { %v540_v47 = vmul.f32 %v539_v36, %v510_v43  ;;  %v511_v48 = vadd.f32 %v498_v31, %v483_v44  ;;  %vm535_vm3 = vcmp.ge.f32.partialorder %v510_v43, 0.0 }
 0x11b   : > { %v843_v49 = vpack.c.bf16 %v513_v46, %v512_v39  ;;  %vm538_vm4 = vcmp.ge.f32.partialorder %v513_v46, 0.0  ;;  %v543_v50 = vmul.f32 %v539_v36, %v513_v46  ;;  %v546_v53 = vsel %vm537_vm2, %v512_v39, %v542_v45  ;;  %578 = sbr.rel (!%p1091_p6) target bundleno = 296 (0x128), region = 85 }
 0x11c   : > { %v838_v51 = vpack.c.bf16 %v511_v48, %v510_v43  ;;  %vm536_vm5 = vcmp.ge.f32.partialorder %v511_v48, 0.0  ;;  %v541_v52 = vmul.f32 %v539_v36, %v511_v48  ;;  %v544_v55 = vsel %vm535_vm3, %v510_v43, %v540_v47 }
 0x11d   : > { %855 = vst [vmem:[%s340_s23 + $0x8] sm:$0xff] %v843_v49   ;;  %v547_v54 = vsel %vm538_vm4, %v513_v46, %v543_v50 }
 0x11e   : > { %v853_v56 = vpack.c.bf16 %v547_v54, %v546_v53  ;;  %839 = vst [vmem:[%s340_s23] sm:$0xff] %v838_v51   ;;  %v545_v57 = vsel %vm536_vm5, %v511_v48, %v541_v52 }
 0x11f   : > { %v848_v58 = vpack.c.bf16 %v545_v57, %v544_v55 }
 0x120   : > { %856 = vst [vmem:[%s346_s7 + $0x8] sm:$0xff] %v853_v56  }
 0x121   : > { %849 = vst [vmem:[%s346_s7] sm:$0xff] %v848_v58  }
 0x124   : > { %v602_v61 = vld [vmem:[%s340_s23 + $0x8] sm:$0xf]  ;;  %v604_v62 = vld [vmem:[%s340_s23 + $0xc] sm:$0xf] }
 0x125   : > { %v598_v59 = vld [vmem:[%s340_s23] sm:$0xf]  ;;  %v600_v60 = vld [vmem:[%s340_s23 + $0x4] sm:$0xf]  ;;  %603 = vst [vmem:[%s582_s12 + $0x10] sm:$0xf] %v602_v61 }
 0x126   : > { %599 = vst [vmem:[%s582_s12] sm:$0xf] %v598_v59  ;;  %601 = vst [vmem:[%s582_s12 + $0x8] sm:$0xf] %v600_v60 }
 0x127   : > { %605 = vst [vmem:[%s582_s12 + $0x18] sm:$0xf] %v604_v62 }
 0x128 PF: > { %636 = sbr.rel (!%p1091_p6) target bundleno = 305 (0x131), region = 126  ;;  %s823_s14 = sshll.u32 (%p1091_p6), %s990_s26, 3 }
 0x129   : > { %s638_s15 = sadd.s32 (%p1091_p6), %s986_s25, %s823_s14 }
 0x12a   : > { %s824_s16 = sshll.u32 (%p1091_p6), %s638_s15, 2 }
 0x12b   : > { %s640_s20 = scalar_lea.vmem (%p1091_p6), %s1188_s6, %s824_s16 }
 0x12d   : > { %v660_v1 = vld [vmem:[%s346_s7 + $0x8] sm:$0xf] (%p1091_p6)  ;;  %v662_v2 = vld [vmem:[%s346_s7 + $0xc] sm:$0xf] (%p1091_p6) }
 0x12e   : > { %v656_v63 = vld [vmem:[%s346_s7] sm:$0xf] (%p1091_p6)  ;;  %v658_v0 = vld [vmem:[%s346_s7 + $0x4] sm:$0xf] (%p1091_p6)  ;;  %661 = vst [vmem:[%s640_s20 + $0x10] sm:$0xf] (%p1091_p6), %v660_v1 }
 0x12f   : > { %657 = vst [vmem:[%s640_s20] sm:$0xf] %v656_v63  ;;  %659 = vst [vmem:[%s640_s20 + $0x8] sm:$0xf] %v658_v0 }
 0x130   : > { %663 = vst [vmem:[%s640_s20 + $0x18] sm:$0xf] %v662_v2 }
 0x131 PF: > { %s18_s29 = sadd.s32 1, %s1002_s29   ;;  %s1190_s23 = smov %s982_s24 }
 0x132   : > { %p15_p12 = scmp.ge.s32.totalorder %s18_s29, 6   ;;  %s1191_s24 = smov %s1099_s13 }
 0x133   : > { %s1192_s25 = smov %s994_s27  ;;  %s1193_s26 = smov %s998_s28 }
 0x134   : > { %s1194_s27 = smov %s1197_s4  ;;  %s1195_s28 = smov %s1201_s30 }
 0x135   :  { %17 = sbr.rel (!%p15_p12) target bundleno = 6 (0x6), region = 210 }

// kernel: competitive_dense_block_input_forward.4
= control target key start
LH: loop header
LB: loop body
LE: loop exit
PB: predicated region body
PF: predicated region fallthrough
CT: control target
= control target key end

     0   :  { %s2848_s0 = inlined_call_operand.vmem [shape: bf16[2,288,256], index: 0, kind: input, shape index: {}]   ;;  %s2849_s1 = inlined_call_operand.vmem [shape: bf16[2,32,256], index: 1, kind: input, shape index: {}]   ;;  %s2850_s2 = inlined_call_operand.vmem [shape: bf16[32,288], index: 2, kind: input, shape index: {}]   ;;  %s2851_s3 = inlined_call_operand.vmem [shape: f32[32,1], index: 3, kind: input, shape index: {}]   ;;  %s2852_s4 = inlined_call_operand.vmem [shape: f32[32,1], index: 4, kind: input, shape index: {}]   ;;  %s2853_s5 = inlined_call_operand.vmem [shape: bf16[32,32], index: 5, kind: input, shape index: {}]   ;;  %s2854_s6 = inlined_call_operand.vmem [shape: f32[32,1], index: 6, kind: input, shape index: {}]   ;;  %s2855_s7 = inlined_call_operand.vmem [shape: f32[32,1], index: 7, kind: input, shape index: {}]   ;;  %s2856_s8 = inlined_call_operand.vmem [shape: f32[4,32], index: 8, kind: input, shape index: {}]   ;;  %s2857_s9 = inlined_call_operand.vmem [shape: f32[4,1], index: 9, kind: input, shape index: {}]   ;;  %s2858_s10 = inlined_call_operand.vmem [shape: f32[4,32], index: 10, kind: input, shape index: {}]   ;;  %s2859_s11 = inlined_call_operand.vmem [shape: f32[4,1], index: 11, kind: input, shape index: {}]   ;;  %s2860_s12 = inlined_call_operand.vmem [shape: bf16[32,32], index: 12, kind: input, shape index: {}]   ;;  %s2861_s13 = inlined_call_operand.vmem [shape: f32[32,1], index: 13, kind: input, shape index: {}]   ;;  %s2862_s14 = inlined_call_operand.<no memory space> [shape: f32[1], index: 14, kind: input, shape index: {}]   ;;  %s2863_s15 = inlined_call_operand.vmem [shape: bf16[2,32,256], index: 15, kind: output, shape index: {0}]   ;;  %s2864_s16 = inlined_call_operand.vmem [shape: f32[2,4,256], index: 16, kind: output, shape index: {1}]   ;;  %s2865_s17 = inlined_call_operand.vmem [shape: f32[2,4,256], index: 17, kind: output, shape index: {2}]   ;;  %s2866_s18 = inlined_call_operand.vmem [shape: bf16[2,32,256], index: 18, kind: output, shape index: {3}]  }
   0x1   :  { %2871 = sst [smem:[#allocation11_spill]] %s2848_s0 }
   0x2   :  { %2872 = sst [smem:[#allocation12_spill]] %s2849_s1 }
   0x3   :  { %2873 = sst [smem:[#allocation13_spill]] %s2850_s2 }
   0x4   :  { %2874 = sst [smem:[#allocation14_spill]] %s2851_s3 }
   0x5   :  { %2875 = sst [smem:[#allocation15_spill]] %s2863_s15 }
   0x6   :  { %2876 = sst [smem:[#allocation16_spill]] %s2865_s17 }
   0x7   :  { %2877 = sst [smem:[#allocation17_spill]] %s2866_s18 }
   0x8   :  { %24 = sst [smem:[#allocation2]] %s2862_s14 }
   0x9   :  { %s2496_s29 = smov 0   ;;  %s2498_s30 = smov 0  }
   0xa   :  { %s2500_s0 = smov 0   ;;  %s2502_s19 = smov 0  }
   0xb   :  { %s2504_s1 = smov 0   ;;  %s2506_s20 = smov 0  }
   0xc   :  { %s2508_s21 = smov 0  }
   0xd LB: > { %s39_s14 = sadd.s32 1, %s2384_s1  ;;  %s42_s22 = sadd.s32 1, %s2388_s20  ;;  %s2392_s21 = sphi %s2508_s21, %s30_s21   ;;  %s2388_s20 = sphi %s2506_s20, %s2901_s20   ;;  %s2384_s1 = sphi %s2504_s1, %s2900_s1   ;;  %s2380_s19 = sphi %s2502_s19, %s2899_s19   ;;  %s2376_s0 = sphi %s2500_s0, %s2898_s0   ;;  %s2372_s30 = sphi %s2498_s30, %s2897_s30   ;;  %s2368_s29 = sphi %s2496_s29, %s2896_s29  }
   0xe   : > { %p40_p0 = scmp.ge.s32.totalorder %s39_s14, 2  ;;  %s2028_s2 = sadd.s32 4294967295, %s2392_s21  }
   0xf   : > { %p58_p1 = scmp.ne.s32.totalorder %s2372_s30, %s2368_s29  ;;  %p59_p2 = scmp.eq.s32.totalorder %s2392_s21, 0 }
  0x10   : > { %s2903_s14 = smov (%p40_p0, %s39_s14), 0  ;;  %s2905_s22 = smov (!%p40_p0, %s42_s22), %s2388_s20 }
  0x11   : > { %2878 = sst [smem:[#allocation7_spill]] %s2903_s14  ;;  %p44_p3 = scmp.ge.s32.totalorder %s2905_s22, 2 }
  0x12   : > { %p391_p4 = scmp.eq.s32.totalorder %s2028_s2, 3  ;;  %s47_s23 = ssub.s32 %s2384_s1, %s2903_s14 }
  0x13   : > { %p2542_p5 = por %p59_p2, %p58_p1  ;;  %s2907_s22 = smov (%p44_p3, %s2905_s22), 0 }
  0x14   : > { %2880 = sst [smem:[#allocation8_spill]] %s2907_s22  ;;  %p2548_p6 = por %p391_p4, %p58_p1 }
  0x15   : > { %s46_s26 = ssub.s32 %s2388_s20, %s2907_s22  ;;  %s51_s28 = sadd.s32 1, %s2372_s30 }
  0x16   : > { %s2881_s25 = scalar_select %p2548_p6, 1, 0 }
  0x17   : > { %s48_s27 = sor.u32 %s47_s23, %s46_s26  ;;  %p2031_p8 = scmp.ge.s32.totalorder %s2392_s21, 4 }
  0x18   : > { %2882 = sst [smem:[#allocation9_spill]] %s2881_s25  ;;  %p49_p7 = scmp.eq.s32.totalorder %s48_s27, 0 }
  0x19   : > { %536 = sbr.rel (%p2031_p8) target bundleno = 77 (0x4d), region = 68 }
  0x1a   : > { %s2556_s18 = scalar_select %p49_p7, %s2372_s30, %s51_s28  }
  0x1c   : > { %2883 = sst [smem:[#allocation10_spill]] %s2556_s18 }
  0x20   : > { %539 = sbr.rel (!%p2542_p5) target bundleno = 65 (0x41), region = 72  ;;  %s541_s2 = sand.u32 (%p2542_p5), 1, %s2372_s30  }
  0x21   : > { %s2244_s14 = smul.u32 (%p2542_p5), 72, %s2388_s20  ;;  %s2884_s26 = sld [smem:[#allocation11_spill]] (%p2542_p5) }
  0x22   : > { %s2243_s15 = smul.u32 (%p2542_p5), 144, %s541_s2 }
  0x23   : > { %s545_s17 = sadd.s32 (%p2542_p5), %s2384_s1, %s2244_s14 }
  0x24   : > { %s2032_s25 = sshll.u32 (%p2542_p5), %s545_s17, 2  ;;  %s2572_s28 = scalar_lea.vmem (%p2542_p5), [#allocation3], %s2243_s15 }
  0x27   : > { %s2567_s27 = scalar_lea.vmem %s2884_s26, %s2032_s25 }
  0x28   : > { %v563_v0 = vld [vmem:[%s2567_s27] sm:$0xf]  ;;  %v565_v1 = vld [vmem:[%s2567_s27 + $0x8] sm:$0xf]  ;;  %v567_v2 = vld [vmem:[%s2567_s27 + $0x10] sm:$0xf] }
  0x29   : > { %564 = vst [vmem:[%s2572_s28] sm:$0xf] %v563_v0  ;;  %566 = vst [vmem:[%s2572_s28 + $0x4] sm:$0xf] %v565_v1  ;;  %v569_v3 = vld [vmem:[%s2567_s27 + $0x18] sm:$0xf] }
  0x2a   : > { %568 = vst [vmem:[%s2572_s28 + $0x8] sm:$0xf] %v567_v2  ;;  %v571_v4 = vld [vmem:[%s2567_s27 + $0x20] sm:$0xf]  ;;  %v573_v5 = vld [vmem:[%s2567_s27 + $0x28] sm:$0xf] }
  0x2b   : > { %570 = vst [vmem:[%s2572_s28 + $0xc] sm:$0xf] %v569_v3  ;;  %572 = vst [vmem:[%s2572_s28 + $0x10] sm:$0xf] %v571_v4  ;;  %v575_v6 = vld [vmem:[%s2567_s27 + $0x30] sm:$0xf] }
  0x2c   : > { %574 = vst [vmem:[%s2572_s28 + $0x14] sm:$0xf] %v573_v5  ;;  %v577_v7 = vld [vmem:[%s2567_s27 + $0x38] sm:$0xf]  ;;  %v579_v8 = vld [vmem:[%s2567_s27 + $0x40] sm:$0xf] }
  0x2d   : > { %576 = vst [vmem:[%s2572_s28 + $0x18] sm:$0xf] %v575_v6  ;;  %578 = vst [vmem:[%s2572_s28 + $0x1c] sm:$0xf] %v577_v7  ;;  %v581_v9 = vld [vmem:[%s2567_s27 + $0x48] sm:$0xf] }
  0x2e   : > { %580 = vst [vmem:[%s2572_s28 + $0x20] sm:$0xf] %v579_v8  ;;  %v583_v10 = vld [vmem:[%s2567_s27 + $0x50] sm:$0xf]  ;;  %v585_v11 = vld [vmem:[%s2567_s27 + $0x58] sm:$0xf] }
  0x2f   : > { %582 = vst [vmem:[%s2572_s28 + $0x24] sm:$0xf] %v581_v9  ;;  %584 = vst [vmem:[%s2572_s28 + $0x28] sm:$0xf] %v583_v10  ;;  %v587_v12 = vld [vmem:[%s2567_s27 + $0x60] sm:$0xf] }
  0x30   : > { %586 = vst [vmem:[%s2572_s28 + $0x2c] sm:$0xf] %v585_v11  ;;  %v589_v13 = vld [vmem:[%s2567_s27 + $0x68] sm:$0xf]  ;;  %v591_v14 = vld [vmem:[%s2567_s27 + $0x70] sm:$0xf] }
  0x31   : > { %588 = vst [vmem:[%s2572_s28 + $0x30] sm:$0xf] %v587_v12  ;;  %590 = vst [vmem:[%s2572_s28 + $0x34] sm:$0xf] %v589_v13  ;;  %v593_v15 = vld [vmem:[%s2567_s27 + $0x78] sm:$0xf] }
  0x32   : > { %592 = vst [vmem:[%s2572_s28 + $0x38] sm:$0xf] %v591_v14  ;;  %v595_v16 = vld [vmem:[%s2567_s27 + $0x80] sm:$0xf]  ;;  %v597_v17 = vld [vmem:[%s2567_s27 + $0x88] sm:$0xf] }
  0x33   : > { %594 = vst [vmem:[%s2572_s28 + $0x3c] sm:$0xf] %v593_v15  ;;  %596 = vst [vmem:[%s2572_s28 + $0x40] sm:$0xf] %v595_v16  ;;  %v599_v18 = vld [vmem:[%s2567_s27 + $0x90] sm:$0xf] }
  0x34   : > { %598 = vst [vmem:[%s2572_s28 + $0x44] sm:$0xf] %v597_v17  ;;  %v601_v19 = vld [vmem:[%s2567_s27 + $0x98] sm:$0xf]  ;;  %v603_v20 = vld [vmem:[%s2567_s27 + $0xa0] sm:$0xf] }
  0x35   : > { %600 = vst [vmem:[%s2572_s28 + $0x48] sm:$0xf] %v599_v18  ;;  %602 = vst [vmem:[%s2572_s28 + $0x4c] sm:$0xf] %v601_v19  ;;  %v605_v21 = vld [vmem:[%s2567_s27 + $0xa8] sm:$0xf] }
  0x36   : > { %604 = vst [vmem:[%s2572_s28 + $0x50] sm:$0xf] %v603_v20  ;;  %v607_v22 = vld [vmem:[%s2567_s27 + $0xb0] sm:$0xf]  ;;  %v609_v23 = vld [vmem:[%s2567_s27 + $0xb8] sm:$0xf] }
  0x37   : > { %606 = vst [vmem:[%s2572_s28 + $0x54] sm:$0xf] %v605_v21  ;;  %608 = vst [vmem:[%s2572_s28 + $0x58] sm:$0xf] %v607_v22  ;;  %v611_v24 = vld [vmem:[%s2567_s27 + $0xc0] sm:$0xf] }
  0x38   : > { %610 = vst [vmem:[%s2572_s28 + $0x5c] sm:$0xf] %v609_v23  ;;  %v613_v25 = vld [vmem:[%s2567_s27 + $0xc8] sm:$0xf]  ;;  %v615_v26 = vld [vmem:[%s2567_s27 + $0xd0] sm:$0xf] }
  0x39   : > { %612 = vst [vmem:[%s2572_s28 + $0x60] sm:$0xf] %v611_v24  ;;  %614 = vst [vmem:[%s2572_s28 + $0x64] sm:$0xf] %v613_v25  ;;  %v617_v27 = vld [vmem:[%s2567_s27 + $0xd8] sm:$0xf] }
  0x3a   : > { %616 = vst [vmem:[%s2572_s28 + $0x68] sm:$0xf] %v615_v26  ;;  %v619_v28 = vld [vmem:[%s2567_s27 + $0xe0] sm:$0xf]  ;;  %v621_v29 = vld [vmem:[%s2567_s27 + $0xe8] sm:$0xf] }
  0x3b   : > { %618 = vst [vmem:[%s2572_s28 + $0x6c] sm:$0xf] %v617_v27  ;;  %620 = vst [vmem:[%s2572_s28 + $0x70] sm:$0xf] %v619_v28  ;;  %v623_v30 = vld [vmem:[%s2567_s27 + $0xf0] sm:$0xf] }
  0x3c   : > { %622 = vst [vmem:[%s2572_s28 + $0x74] sm:$0xf] %v621_v29  ;;  %v625_v31 = vld [vmem:[%s2567_s27 + $0xf8] sm:$0xf]  ;;  %v627_v32 = vld [vmem:[%s2567_s27 + $0x100] sm:$0xf] }
  0x3d   : > { %624 = vst [vmem:[%s2572_s28 + $0x78] sm:$0xf] %v623_v30  ;;  %626 = vst [vmem:[%s2572_s28 + $0x7c] sm:$0xf] %v625_v31  ;;  %v629_v33 = vld [vmem:[%s2567_s27 + $0x108] sm:$0xf] }
  0x3e   : > { %628 = vst [vmem:[%s2572_s28 + $0x80] sm:$0xf] %v627_v32  ;;  %v631_v34 = vld [vmem:[%s2567_s27 + $0x110] sm:$0xf]  ;;  %v633_v35 = vld [vmem:[%s2567_s27 + $0x118] sm:$0xf] }
  0x3f   : > { %630 = vst [vmem:[%s2572_s28 + $0x84] sm:$0xf] %v629_v33  ;;  %632 = vst [vmem:[%s2572_s28 + $0x88] sm:$0xf] %v631_v34 }
  0x40   : > { %634 = vst [vmem:[%s2572_s28 + $0x8c] sm:$0xf] %v633_v35 }
  0x41 PF: > { %729 = sbr.rel (!%p2542_p5) target bundleno = 77 (0x4d), region = 113  ;;  %s731_s15 = sand.u32 (%p2542_p5), 1, %s2372_s30  }
  0x42   : > { %s2034_s17 = sshll.u32 (%p2542_p5), %s2388_s20, 3  ;;  %s2033_s14 = sshll.u32 (%p2542_p5), %s731_s15, 4 }
  0x43   : > { %s735_s22 = sadd.s32 (%p2542_p5), %s2384_s1, %s2034_s17  ;;  %s2885_s26 = sld [smem:[#allocation12_spill]] (%p2542_p5) }
  0x44   : > { %s2035_s25 = sshll.u32 (%p2542_p5), %s735_s22, 2  ;;  %s733_s27 = scalar_lea.vmem (%p2542_p5), [#allocation4], %s2033_s14 }
  0x49   : > { %s737_s18 = scalar_lea.vmem %s2885_s26, %s2035_s25 }
  0x4a   : > { %v753_v36 = vld [vmem:[%s737_s18] sm:$0xf]  ;;  %v755_v37 = vld [vmem:[%s737_s18 + $0x8] sm:$0xf]  ;;  %v757_v38 = vld [vmem:[%s737_s18 + $0x10] sm:$0xf] }
  0x4b   : > { %754 = vst [vmem:[%s733_s27] sm:$0xf] %v753_v36  ;;  %756 = vst [vmem:[%s733_s27 + $0x4] sm:$0xf] %v755_v37  ;;  %v759_v39 = vld [vmem:[%s737_s18 + $0x18] sm:$0xf] }
  0x4c   : > { %758 = vst [vmem:[%s733_s27 + $0x8] sm:$0xf] %v757_v38  ;;  %760 = vst [vmem:[%s733_s27 + $0xc] sm:$0xf] %v759_v39 }
  0x4d PF: > { %p2036_p9 = scmp.ge.s32.totalorder %s2392_s21, 1  ;;  %p790_p10 = scmp.lt.s32.totalorder %s2392_s21, 5 }
  0x4f   : > { %p791_p11 = pnand %p2036_p9, %p790_p10 }
  0x50   : > { %s797_s24 = sand.u32 (!%p791_p11), 1, %s2368_s29   ;;  %vm1080_vm0 = vcmask (!%p791_p11), 261120   ;;  %s2886_s14 = sld [smem:[#allocation13_spill]] (!%p791_p11)  ;;  %v2394_v44 = vmov (!%p791_p11), 0   ;;  %v1213_v56 = vld [vmem:[%s2852_s4] sm:$0xff] (!%p791_p11)  ;;  %v1214_v61 = vld [vmem:[%s2852_s4 + $0x8] sm:$0xff] (!%p791_p11) }
  0x51   : > { %794 = sbr.rel (%p791_p11) target bundleno = 835 (0x343), region = 154  ;;  %2307 = vset.pattern.permute.xlu1 (!%p791_p11), %v2394_v44  ;;  %2306 = vset.pattern.permute.xlu0 (!%p791_p11), %v2394_v44  ;;  %s2887_s3 = sld [smem:[#allocation14_spill]] (!%p791_p11)  ;;  %v1216_v5 = vld [vmem:[%s2852_s4 + $0x18] sm:$0xff] (!%p791_p11)  ;;  %v1215_v6 = vld [vmem:[%s2852_s4 + $0x10] sm:$0xff] (!%p791_p11)  ;;  %v1338_v8 = vld [vmem:[%s2854_s6 + $0x8] sm:$0xff] (!%p791_p11)  ;;  %vm2396_vm5 = vmmov (!%p791_p11), 0  }
  0x52   : > { %s2245_s28 = smul.u32 (!%p791_p11), 144, %s797_s24  ;;  %1219 = vperm.xlu1 (!%p791_p11), %2307, %v1213_v56   ;;  %v1337_v9 = vld [vmem:[%s2854_s6] sm:$0xff] (!%p791_p11)  ;;  %v1366_v11 = vld [vmem:[%s2855_s7 + $0x8] sm:$0xff] (!%p791_p11)  ;;  %v1340_v13 = vld [vmem:[%s2854_s6 + $0x18] sm:$0xff] (!%p791_p11)  ;;  %s2768_s15 = sshll.u32 (!%p791_p11), %s797_s24, 4 }
  0x53   : > { %v1365_v12 = vld [vmem:[%s2855_s7] sm:$0xff] (!%p791_p11)  ;;  %v1339_v14 = vld [vmem:[%s2854_s6 + $0x10] sm:$0xff] (!%p791_p11)  ;;  %v1368_v15 = vld [vmem:[%s2855_s7 + $0x18] sm:$0xff] (!%p791_p11)  ;;  %s897_s17 = sld [smem:[#allocation2]] (!%p791_p11)  ;;  %s806_s18 = scalar_lea.vmem (!%p791_p11), [#allocation4], %s2768_s15 }
  0x54   : > { %s2662_s25 = scalar_lea.vmem (!%p791_p11), [#allocation3], %s2245_s28  ;;  %v1367_v16 = vld [vmem:[%s2855_s7 + $0x10] sm:$0xff] (!%p791_p11)  ;;  %v1578_v17 = vld [vmem:[%s2861_s13 + $0x8] sm:$0xff] (!%p791_p11)  ;;  %v1577_v18 = vld [vmem:[%s2861_s13] sm:$0xff] (!%p791_p11)  ;;  %p880_p12 = scmp.lt.s32.totalorder (!%p791_p11), %s2380_s19, 1 }
  0x55   : > { %v2308_v42 = vld [vmem:[%s2662_s25 + $0x40] sm:$0xff] (!%p791_p11)   ;;  %v2310_v45 = vld [vmem:[%s2662_s25 + $0x48] sm:$0xff] (!%p791_p11)   ;;  %v2312_v47 = vld [vmem:[%s2662_s25 + $0x50] sm:$0xff] (!%p791_p11)   ;;  %p882_p13 = scmp.lt.s32.totalorder (!%p791_p11), %s2376_s0, 1 }
  0x56   : > { %v2328_v40 = vld [vmem:[%s2886_s14 + $0x4] ss:$12 sps:$4 sm:$0xff] (!%p791_p11)   ;;  %v2329_v41 = vld [vmem:[%s2886_s14 + $0x8] ss:$12 sps:$4 sm:$0xff] (!%p791_p11)   ;;  %2135 = vmatprep.subr.bf16.mxu0 (!%p791_p11), %v2308_v42  ;;  %v2330_v60 = vld [vmem:[%s2886_s14 + $0x20] ss:$12 sps:$4 sm:$0xff] (!%p791_p11)   ;;  %1224 = vperm.xlu1 (!%p791_p11), %2307, %v1214_v61  }
  0x57   : > { %1119 = vmatprep.mubr.bf16.mxu0 (!%p791_p11), %v2328_v40  ;;  %2189 = vmatprep.mubr.msk.bf16.mxu1 (!%p791_p11), %vm1080_vm0, %v2329_v41  ;;  %v2309_v43 = vld [vmem:[%s2662_s25] sm:$0xff] (!%p791_p11)   ;;  %v2311_v46 = vld [vmem:[%s2662_s25 + $0x8] sm:$0xff] (!%p791_p11)   ;;  %v2313_v48 = vld [vmem:[%s2662_s25 + $0x10] sm:$0xff] (!%p791_p11)  }
  0x58   : > { %2136 = vmatpush3.bf16.msra.mxu0 %v2309_v43  ;;  %v2314_v49 = vld [vmem:[%s2662_s25 + $0x58] sm:$0xff]   ;;  %v2316_v51 = vld [vmem:[%s2662_s25 + $0x60] sm:$0xff]   ;;  %v2318_v54 = vld [vmem:[%s2662_s25 + $0x68] sm:$0xff]   ;;  %s881_s29 = scalar_select %p880_p12, %s2380_s19, 1 }
  0x59   : > { %2137 = vmatprep.subr.bf16.mxu0 %v2310_v45  ;;  %v2315_v50 = vld [vmem:[%s2662_s25 + $0x18] sm:$0xff]   ;;  %v2322_v52 = vld [vmem:[%s2662_s25 + $0x80] sm:$0xff]   ;;  %v2325_v55 = vld [vmem:[%s2662_s25 + $0x88] sm:$0xff]   ;;  %s883_s24 = scalar_select %p882_p13, %s2376_s0, 1 }
  0x5a   : > { %v2317_v53 = vld [vmem:[%s2662_s25 + $0x20] sm:$0xff]   ;;  %2185 = vmatprep.subr.bf16.mxu1 %v2322_v52  ;;  %v2319_v57 = vld [vmem:[%s2662_s25 + $0x28] sm:$0xff]   ;;  %v2320_v59 = vld [vmem:[%s2662_s25 + $0x70] sm:$0xff]   ;;  %s2040_s22 = sshll.u32 %s881_s29, 1  ;;  %s2890_s27 = sld [smem:[#allocation15_spill]] (%p2548_p6) }
  0x5b   : > { %2186 = vmatpush3.bf16.msra.mxu1 %v2322_v52  ;;  %v1185_v58 = vld [vmem:[%s2887_s3] sm:$0xff]  ;;  %v1186_v62 = vld [vmem:[%s2887_s3 + $0x8] sm:$0xff]  ;;  %v1188_v2 = vld [vmem:[%s2887_s3 + $0x18] sm:$0xff]  ;;  %s885_s2 = sadd.s32 %s2040_s22, %s883_s24  ;;  %s879_s24 = scalar_lea.vmem [#allocation6], %s2768_s15 }
  0x5c   : > { %2138 = vmatpush3.bf16.msra.mxu0 %v2311_v46  ;;  %2187 = vmatprep.subr.bf16.mxu1 %v2325_v55  ;;  %v2321_v63 = vld [vmem:[%s2662_s25 + $0x30] sm:$0xff]   ;;  %v2323_v0 = vld [vmem:[%s2662_s25 + $0x78] sm:$0xff]   ;;  %v2105_v36 = vld [vmem:[%s806_s18] sm:$0xff]   ;;  %s2041_s23 = sshll.u32 %s885_s2, 2 }
  0x5d   : > { %2139 = vmatprep.subr.bf16.mxu0 %v2312_v47  ;;  %1191 = vperm.xlu0 %2306, %v1185_v58   ;;  %v2324_v1 = vld [vmem:[%s2662_s25 + $0x38] sm:$0xff]   ;;  %v1187_v3 = vld [vmem:[%s2887_s3 + $0x10] sm:$0xff]  ;;  %v1494_v21 = vld [vmem:[%s2859_s11] sm:$0xf]  ;;  %v2106_v41 = vunpack.c.l.bf16 %v2105_v36  ;;  %v2107_v45 = vunpack.c.h.bf16 %v2105_v36  ;;  %s2777_s25 = scalar_lea.vmem [#allocation5], %s2768_s15  ;;  %s887_s28 = scalar_lea.vmem %s2864_s16, %s2041_s23 }
  0x5e   : > { %1206 = vperm.xlu1 %2307, %v1188_v2   ;;  %v2326_v4 = vld [vmem:[%s2886_s14] ss:$12 sps:$4 sm:$0xff]   ;;  %v2331_v7 = vld [vmem:[%s2886_s14 + $0x1c] ss:$12 sps:$4 sm:$0xff]   ;;  %v2333_v10 = vld [vmem:[%s2886_s14 + $0x18] ss:$12 sps:$4 sm:$0xff]  }
  0x5f   : > { %2188 = vmatpush3.bf16.msra.mxu1 %v2325_v55  ;;  %v1580_v19 = vld [vmem:[%s2861_s13 + $0x18] sm:$0xff]  ;;  %v1579_v20 = vld [vmem:[%s2861_s13 + $0x10] sm:$0xff]  ;;  %v1414_v22 = vld [vmem:[%s2857_s9] sm:$0xf]  ;;  %s2888_s3 = sld [smem:[#allocation16_spill]] }
  0x60   : > { %2140 = vmatpush3.bf16.msra.mxu0 %v2313_v48  ;;  %v2334_v23 = vld [vmem:[%s2853_s5] sm:$0xff]   ;;  %v2132_v52 = vld [vmem:[%s806_s18 + $0x8] sm:$0xff]  }
  0x61   : > { %2141 = vmatprep.subr.bf16.mxu0 %v2314_v49  ;;  %1196 = vperm.xlu0 %2306, %v1186_v62   ;;  %v2111_v2 = vunpack.c.h.bf16 %v2132_v52 }
  0x62   : > { %2190 = vmatmul.mubr.msk.bf16.vlgmr.msra.gmra.mrb[0].mxu1 %vm1080_vm0, %v2330_v60  ;;  %1234 = vperm.xlu1 %2307, %v1216_v5   ;;  %v2110_v60 = vunpack.c.l.bf16 %v2132_v52 }
  0x63   : > { %2197 = vmatprep.mubr.msk.bf16.mxu1 %vm1080_vm0, %v2334_v23 }
  0x64   : > { %2142 = vmatpush3.bf16.msra.mxu0 %v2315_v50 }
  0x65   : > { %2143 = vmatprep.subr.bf16.mxu0 %v2316_v51  ;;  %1201 = vperm.xlu0 %2306, %v1187_v3   ;;  %s895_s29 = scalar_lea.vmem %s2888_s3, %s2041_s23  ;;  %s2090_s3 = sshll.u32 (%p2548_p6), %s2380_s19, 3 }
  0x66   : > { %1348 = vperm.xlu1 %2307, %v1338_v8   ;;  %s1716_s2 = sadd.s32 (%p2548_p6), %s2376_s0, %s2090_s3 }
  0x67   : > { %s2091_s23 = sshll.u32 (%p2548_p6), %s1716_s2, 2 }
  0x68   : > { %2144 = vmatpush3.bf16.msra.mxu0 %v2317_v53 }
  0x69   : > { %2145 = vmatprep.subr.bf16.mxu0 %v2318_v54  ;;  %1229 = vperm.xlu0 %2306, %v1215_v6   ;;  %v1257_v54 = vstv %s897_s17 }
  0x6a   : > { %1376 = vperm.xlu1 %2307, %v1366_v11  }
  0x6c   : > { %2146 = vmatpush3.bf16.msra.mxu0 %v2319_v57 }
  0x6d   : > { %2147 = vmatprep.subr.bf16.mxu0 %v2320_v59  ;;  %1343 = vperm.xlu0 %2306, %v1337_v9  }
  0x6e   : > { %1358 = vperm.xlu1 %2307, %v1340_v13  }
  0x70   : > { %2148 = vmatpush3.bf16.msra.mxu0 %v2321_v63 }
  0x71   : > { %2149 = vmatprep.subr.bf16.mxu0 %v2323_v0  ;;  %1371 = vperm.xlu0 %2306, %v1365_v12  }
  0x72   : > { %1386 = vperm.xlu1 %2307, %v1368_v15  }
  0x74   : > { %2150 = vmatpush3.bf16.msra.mxu0 %v2324_v1 }
  0x75   : > { %1353 = vperm.xlu0 %2306, %v1339_v14  }
  0x76   : > { %1588 = vperm.xlu1 %2307, %v1578_v17   ;;  %v2335_v17 = vld [vmem:[%s2853_s5 + $0x8] sm:$0xff]  }
  0x77   : > { %1120 = vmatmul.mubr.bf16.vlgmr.msra.gmra.mrb[0].mxu0 %v2326_v4 }
  0x78   : > { %1127 = vmatprep.mubr.bf16.mxu0 %v2331_v7 }
  0x79   : > { %1381 = vperm.xlu0 %2306, %v1367_v16  }
  0x7a   : > { %1598 = vperm.xlu1 %2307, %v1580_v19   ;;  %v2397_v19 = vmov 0.0  }
  0x7d   : > { %1583 = vperm.xlu0 %2306, %v1577_v18   ;;  %v2395_v18 = vmov 0.0|0.0  }
  0x7e   : > { %1497 = vperm.xlu1 %2307, %v1494_v21  }
  0x7f   : > { %1128 = vmatmul.mubr.bf16.gmra.mrb[4].mxu0 %v2333_v10 }
  0x81   : > { %1593 = vperm.xlu0 %2306, %v1579_v20  }
  0x85   : > { %1417 = vperm.xlu0 %2306, %v1414_v22  }
  0xd1   : > { %v1220_v29 = vpop.permute.xlu1 %1219 }
  0xd5   : > { %v1225_v39 = vpop.permute.xlu1 %1224 }
  0xdc   : > { %v1192_v28 = vpop.permute.xlu0 %1191 }
  0xdd   : > { %v1207_v55 = vpop.permute.xlu1 %1206 }
  0xe0   : > { %v1197_v34 = vpop.permute.xlu0 %1196 }
  0xe1   : > { %v1235_v7 = vpop.permute.xlu1 %1234 }
  0xe4   : > { %v1202_v47 = vpop.permute.xlu0 %1201 }
  0xe5   : > { %v1349_v20 = vpop.permute.xlu1 %1348 }
  0xe8   : > { %v1230_v1 = vpop.permute.xlu0 %1229 }
  0xe9   : > { %v1377_v22 = vpop.permute.xlu1 %1376 }
  0xec   : > { %v1344_v21 = vpop.permute.xlu0 %1343 }
  0xf0   : > { %v1372_v23 = vpop.permute.xlu0 %1371 }
 0x135   : > { %v2191_v24 = vpop.f32.mrb[0].mxu1 }
 0x136   : > { %v1170_v25 = vpop.f32.mrb[1].mxu1 }
 0x137   : > { %v2192_v26 = vpop.f32.mrb[2].mxu1 }
 0x138   : > { %v1173_v27 = vpop.f32.mrb[3].mxu1 }
 0x14a   : > { %v2151_v30 = vpop.f32.mrb[0].mxu0 }
 0x14b   : > { %v2152_v31 = vpop.f32.mrb[1].mxu0 }
 0x14c   : > { %v2153_v32 = vadd.f32 %v2152_v31, %v2151_v30  ;;  %v2154_v33 = vpop.f32.mrb[2].mxu0 }
 0x14d   : > { %v2155_v35 = vpop.f32.mrb[3].mxu0 }
 0x14e   : > { %v2156_v37 = vadd.f32 %v2155_v35, %v2154_v33  ;;  %v1171_v38 = vadd.f32 %v2153_v32, %v1170_v25  ;;  %v1354_v25 = vpop.permute.xlu0 %1353 }
 0x150   : > { %v1209_v40 = vmul.f32 %v1192_v28, %v1171_v38  ;;  %v1174_v42 = vadd.f32 %v2156_v37, %v1173_v27 }
 0x152   : > { %v1237_v43 = vadd.f32 %v1220_v29, %v1209_v40  ;;  %v1210_v44 = vmul.f32 %v1197_v34, %v1174_v42  ;;  %v2157_v46 = vpop.f32.mrb[4].mxu0  ;;  %v1382_v34 = vpop.permute.xlu0 %1381  ;;  %v1413_v42 = vld [vmem:[%s2856_s8] sm:$0xf] }
 0x153   : > { %v2158_v48 = vpop.f32.mrb[5].mxu0 }
 0x154   : > { %v1249_v49 = vmax.f32 %v1237_v43, %v2106_v41  ;;  %v1238_v50 = vadd.f32 %v1225_v39, %v1210_v44  ;;  %v2159_v51 = vadd.f32 %v2158_v48, %v2157_v46  ;;  %v2160_v53 = vpop.f32.mrb[6].mxu0  ;;  %v1493_v43 = vld [vmem:[%s2858_s10] sm:$0xf] }
 0x155   : > { %v2161_v56 = vpop.f32.mrb[7].mxu0  ;;  %v2336_v44 = vld [vmem:[%s2860_s12] sm:$0xff]  }
 0x156   : > { %v1250_v57 = vmax.f32 %v1238_v50, %v2107_v45  ;;  %v1179_v58 = vadd.f32 %v2191_v24, %v2159_v51  ;;  %v2162_v59 = vadd.f32 %v2161_v56, %v2160_v53  ;;  %vm1253_vm1 = vcmp.ge.f32.partialorder %v1249_v49, 0.0  ;;  %v1359_v24 = vpop.permute.xlu1 %1358  ;;  %v2337_v45 = vld [vmem:[%s2860_s12 + $0x8] sm:$0xff]   ;;  %v1584_v46 = vpop.permute.xlu0 %1583 }
 0x157   : > { %v1258_v61 = vmul.f32 %v1257_v54, %v1249_v49 }
 0x158   : > { %v1211_v62 = vmul.f32 %v1202_v47, %v1179_v58  ;;  %v1182_v63 = vadd.f32 %v2192_v26, %v2162_v59  ;;  %vm1254_vm2 = vcmp.ge.f32.partialorder %v1250_v57, 0.0  ;;  %v1259_v0 = vmul.f32 %v1257_v54, %v1250_v57 }
 0x159   : > { %v1262_v5 = vsel %vm1253_vm1, %v1249_v49, %v1258_v61 }
 0x15a   : > { %v1239_v3 = vadd.f32 %v1230_v1, %v1211_v62  ;;  %v1212_v4 = vmul.f32 %v1207_v55, %v1182_v63  ;;  %v1263_v6 = vsel %vm1254_vm2, %v1250_v57, %v1259_v0  ;;  %v1387_v33 = vpop.permute.xlu1 %1386  ;;  %v1594_v47 = vpop.permute.xlu0 %1593 }
 0x15b   : > { %v1266_v8 = vpack.c.bf16 %v1263_v6, %v1262_v5 }
 0x15c   : > { %v1251_v9 = vmax.f32 %v1239_v3, %v2110_v60  ;;  %v1240_v10 = vadd.f32 %v1235_v7, %v1212_v4 }
 0x15d   : > { %2193 = vmatprep.subr.bf16.mxu1 %v1266_v8 }
 0x15e   : > { %v1252_v11 = vmax.f32 %v1240_v10, %v2111_v2  ;;  %2194 = vmatpush3.bf16.msra.mxu1 %v1266_v8  ;;  %v1260_v12 = vmul.f32 %v1257_v54, %v1251_v9  ;;  %vm1255_vm3 = vcmp.ge.f32.partialorder %v1251_v9, 0.0  ;;  %v1589_v48 = vpop.permute.xlu1 %1588  ;;  %v1418_v49 = vpop.permute.xlu0 %1417 }
 0x160   : > { %vm1256_vm4 = vcmp.ge.f32.partialorder %v1252_v11, 0.0  ;;  %v1261_v13 = vmul.f32 %v1257_v54, %v1252_v11  ;;  %v1264_v14 = vsel %vm1255_vm3, %v1251_v9, %v1260_v12 }
 0x162   : > { %v1265_v15 = vsel %vm1256_vm4, %v1252_v11, %v1261_v13  ;;  %v1599_v53 = vpop.permute.xlu1 %1598 }
 0x163   : > { %v1267_v16 = vpack.c.bf16 %v1265_v15, %v1264_v14 }
 0x165   : > { %2195 = vmatprep.subr.bf16.mxu1 %v1267_v16 }
 0x166   : > { %2196 = vmatpush3.bf16.msra.mxu1 %v1267_v16  ;;  %v1498_v54 = vpop.permute.xlu1 %1497 }
 0x167   : > { %2231 = vmatprep.subr.bf16.mxu1 %v2395_v18 }
 0x169   : > { %2198 = vmatmul.mubr.msk.bf16.vlgmr.msra.gmra.mrb[4].mxu1 %vm1080_vm0, %v2335_v17 }
 0x16a   : > { %2209 = vmatprep.mubr.msk.f32.mxu1 %vm2396_vm5, %v2397_v19 }
 0x23c   : > { %v2199_v26 = vpop.f32.mrb[4].mxu1 }
 0x23d   : > { %v1363_v27 = vmul.f32 %v2199_v26, %v1354_v25  ;;  %v1322_v28 = vpop.f32.mrb[5].mxu1 }
 0x23e   : > { %v1361_v29 = vmul.f32 %v1344_v21, %v1322_v28  ;;  %v2200_v30 = vpop.f32.mrb[6].mxu1 }
 0x23f   : > { %v1364_v31 = vmul.f32 %v2200_v30, %v1359_v24  ;;  %v1325_v32 = vpop.f32.mrb[7].mxu1  ;;  %v1391_v36 = vadd.f32 %v1382_v34, %v1363_v27 }
 0x240   : > { %v1362_v35 = vmul.f32 %v1349_v20, %v1325_v32  ;;  %v1389_v38 = vadd.f32 %v1372_v23, %v1361_v29 }
 0x241   : > { %v1392_v37 = vadd.f32 %v1387_v33, %v1364_v31 }
 0x242   : > { %v1390_v39 = vadd.f32 %v1377_v22, %v1362_v35 }
 0x243   : > { %v1394_v40 = vpack.c.bf16 %v1392_v37, %v1391_v36 }
 0x244   : > { %v1393_v41 = vpack.c.bf16 %v1390_v39, %v1389_v38 }
 0x245   : > { %2133 = vst [vmem:[%s2777_s25 + $0x8] sm:$0xff] %v1394_v40  }
 0x246   : > { %2116 = vst [vmem:[%s2777_s25] sm:$0xff] %v1393_v41   ;;  %2233 = vmatpush3.bf16.msra.mxu1 %v1393_v41 }
 0x247   : > { %2234 = vmatprep.subr.bf16.mxu1 %v2395_v18 }
 0x24a   : > { %2236 = vmatpush3.bf16.msra.mxu1 %v1394_v40 }
 0x24b   : > { %2237 = vmatprep.subr.bf16.mxu1 %v2395_v18 }
 0x24c   : > { %v1738_v6 = vld [vmem:[%s2777_s25 + $0x8] sm:$0xf] (%p2548_p6)  ;;  %v1740_v7 = vld [vmem:[%s2777_s25 + $0xc] sm:$0xf] (%p2548_p6) }
 0x24d   : > { %2210 = vmatmul.mubr.msk.f32.vlgmr.msra.gmra.mrb[8].mxu1 %vm1080_vm0, %v1413_v42  ;;  %v1734_v4 = vld [vmem:[%s2777_s25] sm:$0xf] (%p2548_p6)  ;;  %v1736_v5 = vld [vmem:[%s2777_s25 + $0x4] sm:$0xf] (%p2548_p6) }
 0x24e   : > { %2239 = vmatpush3.bf16.msra.mxu1 %v1393_v41  ;;  %2220 = vmatprep.mubr.msk.f32.mxu1 %vm2396_vm5, %v2397_v19 }
 0x24f   : > { %2240 = vmatprep.subr.bf16.mxu1 %v2395_v18 }
 0x252   : > { %2242 = vmatpush3.bf16.msra.mxu1 %v1394_v40 }
 0x253   : > { %2223 = vmatprep.subr.bf16.mxu1 %v1393_v41 }
 0x255   : > { %2221 = vmatmul.mubr.msk.f32.vlgmr.msra.gmra.mrb[10].mxu1 %vm1080_vm0, %v1493_v43 }
 0x256   : > { %2224 = vmatpush3.bf16.msra.mxu1 %v1393_v41  ;;  %2227 = vmatprep.mubr.msk.bf16.mxu1 %vm1080_vm0, %v2336_v44 }
 0x257   : > { %2225 = vmatprep.subr.bf16.mxu1 %v1394_v40 }
 0x25a   : > { %2226 = vmatpush3.bf16.msra.mxu1 %v1394_v40 }
 0x25d   : > { %2228 = vmatmul.mubr.msk.bf16.vlgmr.msra.gmra.mrb[12].mxu1 %vm1080_vm0, %v2337_v45 }
 0x320   : > { %v1489_v50 = vpop.f32.mrb[8].mxu1 }
 0x321   : > { %v1490_v51 = vadd.f32 %v1489_v50, %v1418_v49  ;;  %v2211_v52 = vpop.f32.mrb[9].mxu1 }
 0x323   : > { %1666 = vst [vmem:[%s887_s28] sm:$0xf] %v1490_v51  ;;  %s1718_s28 = scalar_lea.vmem (%p2548_p6), %s2890_s27, %s2091_s23 }
 0x324   : > { %1735 = vst [vmem:[%s1718_s28] sm:$0xf] (%p2548_p6), %v1734_v4  ;;  %1737 = vst [vmem:[%s1718_s28 + $0x8] sm:$0xf] (%p2548_p6), %v1736_v5 }
 0x325   : > { %1739 = vst [vmem:[%s1718_s28 + $0x10] sm:$0xf] (%p2548_p6), %v1738_v6  ;;  %1741 = vst [vmem:[%s1718_s28 + $0x18] sm:$0xf] (%p2548_p6), %v1740_v7 }
 0x328   : > { %v1569_v55 = vpop.f32.mrb[10].mxu1 }
 0x329   : > { %v1570_v56 = vadd.f32 %v1569_v55, %v1498_v54  ;;  %v2222_v57 = vpop.f32.mrb[11].mxu1 }
 0x32b   : > { %1667 = vst [vmem:[%s895_s29] sm:$0xf] %v1570_v56 }
 0x330   : > { %v2229_v58 = vpop.f32.mrb[12].mxu1 }
 0x331   : > { %v1651_v59 = vpop.f32.mrb[13].mxu1  ;;  %v1660_v61 = vadd.f32 %v2229_v58, %v1594_v47 }
 0x332   : > { %v2230_v60 = vpop.f32.mrb[14].mxu1  ;;  %v1652_v0 = vadd.f32 %v1651_v59, %v1584_v46  ;;  %1714 = sbr.rel (!%p2548_p6) target bundleno = 825 (0x339), region = 166 }
 0x333   : > { %v1663_v62 = vadd.f32 %v2230_v60, %v1599_v53  ;;  %v1654_v63 = vpop.f32.mrb[15].mxu1 }
 0x334   : > { %v1655_v1 = vadd.f32 %v1654_v63, %v1589_v48 }
 0x335   : > { %v2130_v2 = vpack.c.bf16 %v1663_v62, %v1660_v61 }
 0x336   : > { %v2125_v3 = vpack.c.bf16 %v1655_v1, %v1652_v0 }
 0x337   : > { %2134 = vst [vmem:[%s879_s24 + $0x8] sm:$0xff] %v2130_v2  }
 0x338   : > { %2126 = vst [vmem:[%s879_s24] sm:$0xff] %v2125_v3  }
 0x339 PF: > { %1778 = sbr.rel (!%p2548_p6) target bundleno = 835 (0x343), region = 215  ;;  %s2092_s18 = sshll.u32 (%p2548_p6), %s2380_s19, 3 }
 0x33a   : > { %s1780_s29 = sadd.s32 (%p2548_p6), %s2376_s0, %s2092_s18  ;;  %s2892_s2 = sld [smem:[#allocation17_spill]] (%p2548_p6) }
 0x33b   : > { %s2093_s25 = sshll.u32 (%p2548_p6), %s1780_s29, 2 }
 0x33e   : > { %v1802_v10 = vld [vmem:[%s879_s24 + $0x8] sm:$0xf] (%p2548_p6)  ;;  %v1804_v11 = vld [vmem:[%s879_s24 + $0xc] sm:$0xf] (%p2548_p6) }
 0x33f   : > { %v1798_v8 = vld [vmem:[%s879_s24] sm:$0xf] (%p2548_p6)  ;;  %v1800_v9 = vld [vmem:[%s879_s24 + $0x4] sm:$0xf] (%p2548_p6) }
 0x340   : > { %s1782_s23 = scalar_lea.vmem %s2892_s2, %s2093_s25 }
 0x341   : > { %1799 = vst [vmem:[%s1782_s23] sm:$0xf] %v1798_v8  ;;  %1801 = vst [vmem:[%s1782_s23 + $0x8] sm:$0xf] %v1800_v9 }
 0x342   : > { %1803 = vst [vmem:[%s1782_s23 + $0x10] sm:$0xf] %v1802_v10  ;;  %1805 = vst [vmem:[%s1782_s23 + $0x18] sm:$0xf] %v1804_v11 }
 0x343 PF: > { %s30_s21 = sadd.s32 1, %s2392_s21   ;;  %s2893_s19 = sld [smem:[#allocation10_spill]] }
 0x344   : > { %p27_p0 = scmp.ge.s32.totalorder %s30_s21, 6   ;;  %s2894_s26 = sld [smem:[#allocation7_spill]] }
 0x345   : > { %s2895_s24 = sld [smem:[#allocation8_spill]]  ;;  %s2896_s29 = smov %s2372_s30 }
 0x346   : > { %s2898_s0 = smov %s2384_s1  ;;  %29 = sbr.rel (!%p27_p0) target bundleno = 13 (0xd), region = 323 }
 0x349   : > { %s2897_s30 = smov %s2893_s19  ;;  %s2899_s19 = smov %s2388_s20 }
 0x34a   : > { %s2900_s1 = smov %s2894_s26 }
 0x34b   : > { %s2901_s20 = smov %s2895_s24 }

// kernel: competitive_dense_block_input_forward.5
= control target key start
LH: loop header
LB: loop body
LE: loop exit
PB: predicated region body
PF: predicated region fallthrough
CT: control target
= control target key end

     0   :  { %s1918_s0 = inlined_call_operand.vmem [shape: f32[2,4,256], index: 0, kind: input, shape index: {}]   ;;  %s1919_s1 = inlined_call_operand.vmem [shape: f32[2,4,256], index: 1, kind: input, shape index: {}]   ;;  %s1920_s2 = inlined_call_operand.vmem [shape: bf16[2,32,256], index: 2, kind: input, shape index: {}]   ;;  %s1921_s3 = inlined_call_operand.vmem [shape: bf16[2,32,256], index: 3, kind: input, shape index: {}]   ;;  %s1922_s4 = inlined_call_operand.vmem [shape: f32[32,1], index: 4, kind: input, shape index: {}]   ;;  %s1923_s5 = inlined_call_operand.vmem [shape: f32[32,1], index: 5, kind: input, shape index: {}]   ;;  %s1924_s6 = inlined_call_operand.<no memory space> [shape: f32[1], index: 6, kind: input, shape index: {}]   ;;  %s1925_s7 = inlined_call_operand.vmem [shape: f32[2,32,256], index: 7, kind: output, shape index: {}]  }
   0x1   :  { %1933 = sst [smem:[#allocation16_spill]] %s1920_s2 }
   0x2   :  { %1934 = sst [smem:[#allocation17_spill]] %s1921_s3 }
   0x3   :  { %1935 = sst [smem:[#allocation18_spill]] %s1923_s5 }
   0x4   :  { %1936 = sst [smem:[#allocation19_spill]] %s1925_s7 }
   0x5   :  { %12 = sst [smem:[#allocation5]] %s1924_s6 }
   0x6   :  { %s1614_s26 = smov 0   ;;  %s1616_s27 = smov 0  }
   0x7   :  { %s1618_s28 = smov 0   ;;  %s1620_s29 = smov 0  }
   0x8   :  { %s1622_s30 = smov 0   ;;  %s1624_s8 = smov 0  }
   0x9   :  { %s1626_s9 = smov 0   ;;  %s1628_s10 = smov 0  }
   0xa   :  { %s1630_s11 = smov 0   ;;  %s1632_s12 = smov 0  }
   0xb   :  { %s1634_s6 = smov 0  }
   0xc LB: > { %1937 = sst [smem:[#allocation9_spill]] %s1554_s10  ;;  %s30_s13 = sadd.s32 1, %s1554_s10  ;;  %s1566_s6 = sphi %s1634_s6, %s18_s6   ;;  %s1562_s12 = sphi %s1632_s12, %s1957_s12   ;;  %s1558_s11 = sphi %s1630_s11, %s1956_s11   ;;  %s1554_s10 = sphi %s1628_s10, %s1955_s10   ;;  %s1550_s9 = sphi %s1626_s9, %s1954_s9   ;;  %s1546_s8 = sphi %s1624_s8, %s1962_s8   ;;  %s1542_s30 = sphi %s1622_s30, %s1952_s30   ;;  %s1538_s29 = sphi %s1620_s29, %s1961_s29   ;;  %s1534_s28 = sphi %s1618_s28, %s1960_s28   ;;  %s1530_s27 = sphi %s1616_s27, %s1959_s27   ;;  %s1526_s26 = sphi %s1614_s26, %s1958_s26  }
   0xd   : > { %1938 = sst [smem:[#allocation10_spill]] %s1558_s11  ;;  %p31_p0 = scmp.ge.s32.totalorder %s30_s13, 2 }
   0xe   : > { %1939 = sst [smem:[#allocation11_spill]] %s1562_s12  ;;  %s33_s14 = sadd.s32 1, %s1558_s11 }
   0xf   : > { %s1964_s13 = smov (%p31_p0, %s30_s13), 0  ;;  %s1966_s14 = smov (!%p31_p0, %s33_s14), %s1558_s11 }
  0x10   : > { %1940 = sst [smem:[#allocation12_spill]] %s1964_s13  ;;  %s37_s15 = sadd.s32 1, %s1562_s12 }
  0x11   : > { %p109_p1 = scmp.ne.s32.totalorder %s1538_s29, %s1534_s28  ;;  %p35_p2 = scmp.ge.s32.totalorder %s1966_s14, 2 }
  0x12   : > { %p110_p3 = scmp.eq.s32.totalorder %s1566_s6, 0  ;;  %s1222_s16 = sadd.s32 4294967295, %s1566_s6  }
  0x13   : > { %p137_p4 = scmp.ne.s32.totalorder %s1530_s27, %s1526_s26  ;;  %s1968_s14 = smov (%p35_p2, %s1966_s14), 0 }
  0x14   : > { %1941 = sst [smem:[#allocation13_spill]] %s1968_s14  ;;  %s1970_s15 = smov (!%p35_p2, %s37_s15), %s1562_s12 }
  0x15   : > { %s98_s17 = ssub.s32 %s1554_s10, %s1964_s13  ;;  %p1686_p5 = por %p110_p3, %p109_p1 }
  0x16   : > { %p39_p6 = scmp.ge.s32.totalorder %s1970_s15, 2  ;;  %p1690_p7 = por %p137_p4, %p110_p3 }
  0x17   : > { %s126_s20 = ssub.s32 %s1558_s11, %s1968_s14  ;;  %p232_p8 = scmp.eq.s32.totalorder %s1222_s16, 7 }
  0x18   : > { %s1972_s15 = smov (%p39_p6, %s1970_s15), 0  ;;  %s102_s21 = sadd.s32 1, %s1538_s29 }
  0x19   : > { %1944 = sst [smem:[#allocation14_spill]] %s1972_s15  ;;  %p1699_p9 = por %p232_p8, %p137_p4 }
  0x1a   : > { %s97_s23 = ssub.s32 %s1562_s12, %s1972_s15  ;;  %s130_s24 = sadd.s32 1, %s1530_s27 }
  0x1b   : > { %s99_s25 = sor.u32 %s98_s17, %s97_s23  ;;  %s127_s13 = sor.u32 %s126_s20, %s97_s23 }
  0x1c   : > { %p100_p10 = scmp.eq.s32.totalorder %s99_s25, 0  ;;  %p128_p11 = scmp.eq.s32.totalorder %s127_s13, 0 }
  0x1d   : > { %p1225_p12 = scmp.ge.s32.totalorder %s1566_s6, 8 }
  0x1e   : > { %s1707_s7 = scalar_select %p100_p10, %s1538_s29, %s102_s21  }
  0x1f   : > { %s1710_s5 = scalar_select %p128_p11, %s1530_s27, %s130_s24  }
  0x20   : > { %1946 = sst [smem:[#allocation15_spill]] %s1707_s7  ;;  %263 = sbr.rel (%p1225_p12) target bundleno = 63 (0x3f), region = 28 }
  0x27   : > { %288 = sbr.rel (!%p1686_p5) target bundleno = 51 (0x33), region = 40  ;;  %s290_s16 = sand.u32 (%p1686_p5), 1, %s1538_s29  }
  0x28   : > { %s1227_s15 = sshll.u32 (%p1686_p5), %s1562_s12, 3  ;;  %s1226_s14 = sshll.u32 (%p1686_p5), %s290_s16, 4 }
  0x29   : > { %s294_s17 = sadd.s32 (%p1686_p5), %s1554_s10, %s1227_s15  ;;  %s1947_s2 = sld [smem:[#allocation16_spill]] (%p1686_p5) }
  0x2a   : > { %s1228_s20 = sshll.u32 (%p1686_p5), %s294_s17, 2  ;;  %s292_s24 = scalar_lea.vmem (%p1686_p5), [#allocation6], %s1226_s14 }
  0x2f   : > { %s296_s21 = scalar_lea.vmem %s1947_s2, %s1228_s20 }
  0x30   : > { %v312_v0 = vld [vmem:[%s296_s21] sm:$0xf]  ;;  %v314_v1 = vld [vmem:[%s296_s21 + $0x8] sm:$0xf]  ;;  %v316_v2 = vld [vmem:[%s296_s21 + $0x10] sm:$0xf] }
  0x31   : > { %313 = vst [vmem:[%s292_s24] sm:$0xf] %v312_v0  ;;  %315 = vst [vmem:[%s292_s24 + $0x4] sm:$0xf] %v314_v1  ;;  %v318_v3 = vld [vmem:[%s296_s21 + $0x18] sm:$0xf] }
  0x32   : > { %317 = vst [vmem:[%s292_s24 + $0x8] sm:$0xf] %v316_v2  ;;  %319 = vst [vmem:[%s292_s24 + $0xc] sm:$0xf] %v318_v3 }
  0x33 PF: > { %350 = sbr.rel (!%p1690_p7) target bundleno = 63 (0x3f), region = 81  ;;  %s352_s15 = sand.u32 (%p1690_p7), 1, %s1530_s27  }
  0x34   : > { %s1230_s18 = sshll.u32 (%p1690_p7), %s1562_s12, 3  ;;  %s1229_s25 = sshll.u32 (%p1690_p7), %s352_s15, 4 }
  0x35   : > { %s356_s16 = sadd.s32 (%p1690_p7), %s1558_s11, %s1230_s18  ;;  %s1948_s3 = sld [smem:[#allocation17_spill]] (%p1690_p7) }
  0x36   : > { %s1231_s17 = sshll.u32 (%p1690_p7), %s356_s16, 2  ;;  %s354_s13 = scalar_lea.vmem (%p1690_p7), [#allocation7], %s1229_s25 }
  0x3b   : > { %s358_s14 = scalar_lea.vmem %s1948_s3, %s1231_s17 }
  0x3c   : > { %v374_v4 = vld [vmem:[%s358_s14] sm:$0xf]  ;;  %v376_v5 = vld [vmem:[%s358_s14 + $0x8] sm:$0xf]  ;;  %v378_v6 = vld [vmem:[%s358_s14 + $0x10] sm:$0xf] }
  0x3d   : > { %375 = vst [vmem:[%s354_s13] sm:$0xf] %v374_v4  ;;  %377 = vst [vmem:[%s354_s13 + $0x4] sm:$0xf] %v376_v5  ;;  %v380_v7 = vld [vmem:[%s358_s14 + $0x18] sm:$0xf] }
  0x3e   : > { %379 = vst [vmem:[%s354_s13 + $0x8] sm:$0xf] %v378_v6  ;;  %381 = vst [vmem:[%s354_s13 + $0xc] sm:$0xf] %v380_v7 }
  0x3f PF: > { %p1232_p13 = scmp.ge.s32.totalorder %s1566_s6, 1  ;;  %p411_p0 = scmp.lt.s32.totalorder %s1566_s6, 9 }
  0x41   : > { %p412_p1 = pnand %p1232_p13, %p411_p0 }
  0x42   : > { %s418_s19 = sand.u32 (!%p412_p1), 1, %s1534_s28   ;;  %s425_s21 = sand.u32 (!%p412_p1), 1, %s1526_s26  }
  0x43   : > { %415 = sbr.rel (%p412_p1) target bundleno = 808 (0x328), region = 122  ;;  %s1733_s24 = sshll.u32 (!%p412_p1), %s418_s19, 4 }
  0x44   : > { %s1735_s15 = sshll.u32 (!%p412_p1), %s425_s21, 4  ;;  %s1235_s18 = sshll.u32 (!%p412_p1), %s425_s21, 5 }
  0x45   : > { %p475_p2 = scmp.lt.s32.totalorder (!%p412_p1), %s1550_s9, 1  ;;  %p477_p3 = scmp.lt.s32.totalorder (!%p412_p1), %s1546_s8, 1 }
  0x46   : > { %p485_p4 = scmp.lt.s32.totalorder (!%p412_p1), %s1542_s30, 1  ;;  %s420_s21 = scalar_lea.vmem (!%p412_p1), [#allocation6], %s1733_s24 }
  0x47   : > { %s427_s10 = scalar_lea.vmem (!%p412_p1), [#allocation7], %s1735_s15  ;;  %s1751_s7 = scalar_lea.vmem (!%p412_p1), [#allocation8], %s1235_s18 }
  0x48   : > { %p1240_p5 = scmp.ne.s32.totalorder (!%p412_p1), %s1542_s30, 0 }
  0x4a   : > { %s476_s25 = scalar_select %p475_p2, %s1550_s9, 1 }
  0x4b   : > { %s478_s16 = scalar_select %p477_p3, %s1546_s8, 1 }
  0x4c   : > { %s1236_s17 = sshll.u32 %s476_s25, 1  ;;  %v1568_v8 = vmov (!%p1240_p5), -inf   ;;  %v1569_v9 = vmov (!%p1240_p5), 0.0  }
  0x4d   : > { %s480_s20 = sadd.s32 %s1236_s17, %s478_s16  ;;  %496 = vst [vmem:[#allocation2] sm:$0x1] (!%p1240_p5), %v1568_v8  ;;  %497 = vst [vmem:[#allocation3] sm:$0x1] (!%p1240_p5), %v1569_v9 }
  0x4e   : > { %s1237_s23 = sshll.u32 %s480_s20, 2  ;;  %495 = sbr.rel (%p1240_p5) target bundleno = 85 (0x55), region = 134  ;;  %498 = vst [vmem:[#allocation4] sm:$0xff] (!%p1240_p5), %v1569_v9  ;;  %499 = vst [vmem:[#allocation4 + $0x8] sm:$0xff] (!%p1240_p5), %v1569_v9 }
  0x4f   : > { %s482_s28 = scalar_lea.vmem %s1918_s0, %s1237_s23  ;;  %500 = vst [vmem:[#allocation4 + $0x10] sm:$0xff] (!%p1240_p5), %v1569_v9  ;;  %501 = vst [vmem:[#allocation4 + $0x18] sm:$0xff] (!%p1240_p5), %v1569_v9 }
  0x50   : > { %s486_s26 = scalar_select %p485_p4, %s1542_s30, 1 }
  0x52   : > { %s488_s19 = sadd.s32 %s1236_s17, %s486_s26 }
  0x53   : > { %s1239_s2 = sshll.u32 %s488_s19, 2 }
  0x54   : > { %s490_s11 = scalar_lea.vmem %s1919_s1, %s1239_s2 }
  0x55 PF: > { %v503_v10 = vld [vmem:[%s490_s11] sm:$0xf]  ;;  %vm585_vm0 = vcmask 1043456   ;;  %vm536_vm1 = vcmask 31744   ;;  %v761_v62 = vlaneseq  ;;  %p1260_p6 = scmp.ne.s32.totalorder %s1542_s30, 1 }
  0x56   : > { %504 = vxpose.xlu0.b32.start.end [1/1] (short) %v503_v10, 128  ;;  %v502_v11 = vld [vmem:[%s482_s28] sm:$0xf]  ;;  %s1949_s20 = sld [smem:[#allocation18_spill]] (!%p1260_p6) }
  0x57   : > { %1302 = vmatprep.subr.msk.mxu0 %vm585_vm0, %v502_v11  ;;  %v1440_v32 = vld [vmem:[%s420_s21] sm:$0xff]   ;;  %v762_v1 = vshrl.u32 %v761_v62, 7  ;;  %v734_v3 = vld [vmem:[#allocation2] sm:$0x1] }
  0x58   : > { %1303 = vmatpush3.msk.msra.mxu0 %vm585_vm0, %v502_v11  ;;  %1344 = vmatprep.mubr.bf16.mxu1 %v1440_v32 }
  0x59   : > { %v1811_v5 = vsub.s32 0, %v762_v1 }
  0xd6   : > { %v520_v12 = vpop.trf.xlu0 }
  0xd7   : > { %1304 = vmatprep.mubr.msk.f32.mxu0 %vm536_vm1, %v520_v12 }
  0xda   : > { %v521_v13 = vpop.trf.xlu0 }
  0xdb   : > { %1305 = vmatmul.mubr.msk.f32.vlgmr.msra.gmra.mrb[0].mxu0 %vm536_vm1, %v521_v13 }
  0xde   : > { %v522_v14 = vpop.trf.xlu0 }
  0xdf   : > { %1307 = vmatprep.mubr.msk.f32.mxu0 %vm536_vm1, %v522_v14 }
  0xe2   : > { %v523_v15 = vpop.trf.xlu0 }
  0xe3   : > { %1308 = vmatmul.mubr.msk.f32.gmra.mrb[2].mxu0 %vm536_vm1, %v523_v15 }
  0xe6   : > { %v524_v16 = vpop.trf.xlu0 }
  0xe7   : > { %1310 = vmatprep.mubr.msk.f32.mxu0 %vm536_vm1, %v524_v16 }
  0xea   : > { %v525_v17 = vpop.trf.xlu0 }
  0xeb   : > { %1311 = vmatmul.mubr.msk.f32.gmra.mrb[4].mxu0 %vm536_vm1, %v525_v17 }
  0xee   : > { %v526_v18 = vpop.trf.xlu0 }
  0xef   : > { %1313 = vmatprep.mubr.msk.f32.mxu0 %vm536_vm1, %v526_v18 }
  0xf2   : > { %v527_v19 = vpop.trf.xlu0 }
  0xf3   : > { %1314 = vmatmul.mubr.msk.f32.gmra.mrb[6].mxu0 %vm536_vm1, %v527_v19 }
  0xf6   : > { %v528_v20 = vpop.trf.xlu0 }
  0xf7   : > { %1316 = vmatprep.mubr.msk.f32.mxu0 %vm536_vm1, %v528_v20 }
  0xfa   : > { %v529_v21 = vpop.trf.xlu0 }
  0xfb   : > { %1317 = vmatmul.mubr.msk.f32.gmra.mrb[8].mxu0 %vm536_vm1, %v529_v21 }
  0xfe   : > { %v530_v22 = vpop.trf.xlu0 }
  0xff   : > { %1319 = vmatprep.mubr.msk.f32.mxu0 %vm536_vm1, %v530_v22 }
 0x102   : > { %v531_v23 = vpop.trf.xlu0 }
 0x103   : > { %1320 = vmatmul.mubr.msk.f32.gmra.mrb[10].mxu0 %vm536_vm1, %v531_v23 }
 0x106   : > { %v532_v24 = vpop.trf.xlu0 }
 0x107   : > { %1322 = vmatprep.mubr.msk.f32.mxu0 %vm536_vm1, %v532_v24 }
 0x10a   : > { %v533_v25 = vpop.trf.xlu0 }
 0x10b   : > { %1323 = vmatmul.mubr.msk.f32.gmra.mrb[12].mxu0 %vm536_vm1, %v533_v25 }
 0x10e   : > { %v534_v26 = vpop.trf.xlu0 }
 0x10f   : > { %1325 = vmatprep.mubr.msk.f32.mxu0 %vm536_vm1, %v534_v26 }
 0x112   : > { %v535_v27 = vpop.trf.xlu0 }
 0x113   : > { %1326 = vmatmul.mubr.msk.f32.gmra.mrb[14].mxu0 %vm536_vm1, %v535_v27 }
 0x1ae   : > { %v1770_v28 = vpop.f32.mrb[0].mxu0 }
 0x1af   : > { %v1772_v29 = vpop.f32.mrb[1].mxu0 }
 0x1b6   : > { %v1774_v30 = vpop.f32.mrb[2].mxu0 }
 0x1b7   : > { %v1776_v31 = vpop.f32.mrb[3].mxu0 }
 0x1be   : > { %v1780_v33 = vpop.f32.mrb[4].mxu0 }
 0x1bf   : > { %v736_v34 = vmax.f32 %v1770_v28, %v1780_v33  ;;  %v675_v35 = vpop.f32.mrb[5].mxu0 }
 0x1c0   : > { %v735_v36 = vmax.f32 %v1772_v29, %v675_v35 }
 0x1c6   : > { %v1785_v37 = vpop.f32.mrb[6].mxu0 }
 0x1c7   : > { %v738_v38 = vmax.f32 %v1774_v30, %v1785_v37  ;;  %v685_v39 = vpop.f32.mrb[7].mxu0 }
 0x1c8   : > { %v737_v40 = vmax.f32 %v1776_v31, %v685_v39 }
 0x1ce   : > { %v1790_v41 = vpop.f32.mrb[8].mxu0 }
 0x1cf   : > { %v740_v42 = vmax.f32 %v736_v34, %v1790_v41  ;;  %v695_v43 = vpop.f32.mrb[9].mxu0 }
 0x1d0   : > { %v739_v44 = vmax.f32 %v735_v36, %v695_v43 }
 0x1d6   : > { %v1793_v45 = vpop.f32.mrb[10].mxu0 }
 0x1d7   : > { %v742_v46 = vmax.f32 %v738_v38, %v1793_v45  ;;  %v1796_v47 = vpop.f32.mrb[11].mxu0 }
 0x1d8   : > { %v741_v48 = vmax.f32 %v737_v40, %v1796_v47 }
 0x1de   : > { %v1799_v49 = vpop.f32.mrb[12].mxu0 }
 0x1df   : > { %v744_v50 = vmax.f32 %v740_v42, %v1799_v49  ;;  %v1802_v51 = vpop.f32.mrb[13].mxu0 }
 0x1e0   : > { %v743_v52 = vmax.f32 %v739_v44, %v1802_v51 }
 0x1e2   : > { %v747_v53 = vmax.f32 %v743_v52, %v744_v50 }
 0x1e6   : > { %v1805_v54 = vpop.f32.mrb[14].mxu0 }
 0x1e7   : > { %v746_v55 = vmax.f32 %v742_v46, %v1805_v54  ;;  %v1808_v56 = vpop.f32.mrb[15].mxu0 }
 0x1e8   : > { %v745_v57 = vmax.f32 %v741_v48, %v1808_v56 }
 0x1ea   : > { %v748_v58 = vmax.f32 %v745_v57, %v746_v55 }
 0x1ec   : > { %v749_v59 = vmax.f32 %v747_v53, %v748_v58 }
 0x1ee   : > { %v750_v60 = vrot.slane %v749_v59, 4 }
 0x1f0   : > { %v751_v61 = vmax.f32 %v749_v59, %v750_v60 }
 0x1f2   : > { %v752_v63 = vrot.slane %v751_v61, 2 }
 0x1f4   : > { %v753_v0 = vmax.f32 %v751_v61, %v752_v63 }
 0x1f6   : > { %v754_v2 = vrot.slane %v753_v0, 1 }
 0x1f8   : > { %v755_v4 = vmax.f32 %v753_v0, %v754_v2 }
 0x1fa   : > { %v756_v6 = vmax.f32 %v734_v3, %v755_v4 }
 0x1fc   : > { %v757_v7 = vsub.f32 %v734_v3, %v756_v6  ;;  %v764_v8 = vrot.slane %v756_v6, %v1811_v5  ;;  %934 = vst [vmem:[#allocation2] sm:$0x1] %v756_v6 }
 0x1fe   : > { %v758_v9 = vmul.f32 1.442695, %v757_v7  ;;  %v766_v10 = vsub.f32 %v1772_v29, %v764_v8  ;;  %v767_v11 = vsub.f32 %v1770_v28, %v764_v8  ;;  %v768_v12 = vsub.f32 %v1776_v31, %v764_v8 }
 0x1ff   : > { %v769_v13 = vsub.f32 %v1774_v30, %v764_v8  ;;  %v770_v14 = vsub.f32 %v675_v35, %v764_v8  ;;  %v771_v15 = vsub.f32 %v1780_v33, %v764_v8  ;;  %v772_v16 = vsub.f32 %v685_v39, %v764_v8 }
 0x200   : > { %1442 = vpow2.f32 %v758_v9  ;;  %v773_v17 = vsub.f32 %v1785_v37, %v764_v8  ;;  %v774_v18 = vsub.f32 %v695_v43, %v764_v8  ;;  %v775_v19 = vsub.f32 %v1790_v41, %v764_v8 }
 0x201   : > { %v776_v20 = vsub.f32 %v1796_v47, %v764_v8  ;;  %v777_v21 = vsub.f32 %v1793_v45, %v764_v8  ;;  %v778_v22 = vsub.f32 %v1802_v51, %v764_v8  ;;  %v779_v23 = vsub.f32 %v1799_v49, %v764_v8 }
 0x202   : > { %v780_v24 = vsub.f32 %v1808_v56, %v764_v8  ;;  %v781_v25 = vsub.f32 %v1805_v54, %v764_v8  ;;  %v782_v26 = vmul.f32 1.442695, %v766_v10  ;;  %v784_v27 = vmul.f32 1.442695, %v767_v11 }
 0x203   : > { %v786_v28 = vmul.f32 1.442695, %v768_v12  ;;  %v788_v29 = vmul.f32 1.442695, %v769_v13  ;;  %v790_v30 = vmul.f32 1.442695, %v770_v14 }
 0x204   : > { %1444 = vpow2.f32 %v782_v26  ;;  %v792_v31 = vmul.f32 1.442695, %v771_v15  ;;  %v794_v32 = vmul.f32 1.442695, %v772_v16  ;;  %v796_v33 = vmul.f32 1.442695, %v773_v17 }
 0x205   : > { %1446 = vpow2.f32 %v784_v27  ;;  %v798_v34 = vmul.f32 1.442695, %v774_v18  ;;  %v800_v35 = vmul.f32 1.442695, %v775_v19  ;;  %v802_v37 = vmul.f32 1.442695, %v776_v20 }
 0x206   : > { %1448 = vpow2.f32 %v786_v28  ;;  %v804_v38 = vmul.f32 1.442695, %v777_v21  ;;  %v806_v40 = vmul.f32 1.442695, %v778_v22  ;;  %v808_v41 = vmul.f32 1.442695, %v779_v23 }
 0x207   : > { %1450 = vpow2.f32 %v788_v29  ;;  %v810_v43 = vmul.f32 1.442695, %v780_v24  ;;  %v812_v45 = vmul.f32 1.442695, %v781_v25  ;;  %v1441_v21 = vld [vmem:[%s420_s21 + $0x8] sm:$0xff]   ;;  %s955_s21 = sld [smem:[#allocation5]] (!%p1260_p6) }
 0x208   : > { %1452 = vpow2.f32 %v790_v30  ;;  %v814_v25 = vld [vmem:[#allocation3] sm:$0x1]  ;;  %v841_v30 = vld [vmem:[#allocation4 + $0x10] sm:$0xff] }
 0x209   : > { %1454 = vpow2.f32 %v792_v31  ;;  %v839_v31 = vld [vmem:[#allocation4] sm:$0xff] }
 0x20a   : > { %v1827_v36 = vpop.eup %1442  ;;  %1456 = vpow2.f32 %v794_v32  ;;  %v842_v32 = vld [vmem:[#allocation4 + $0x18] sm:$0xff] }
 0x20b   : > { %1458 = vpow2.f32 %v796_v33  ;;  %v1831_v39 = vrot.slane %v1827_v36, %v1811_v5  ;;  %v815_v27 = vmul.f32 %v1827_v36, %v814_v25 }
 0x20c   : > { %1460 = vpow2.f32 %v798_v34  ;;  %v840_v34 = vld [vmem:[#allocation4 + $0x8] sm:$0xff] }
 0x20d   : > { %1462 = vpow2.f32 %v800_v35  ;;  %v851_v33 = vmul.f32 %v1831_v39, %v841_v30  ;;  %v850_v36 = vmul.f32 %v1831_v39, %v840_v34 }
 0x20e   : > { %v1445_v42 = vpop.eup %1444  ;;  %1464 = vpow2.f32 %v802_v37  ;;  %v849_v37 = vmul.f32 %v1831_v39, %v839_v31 }
 0x20f   : > { %v1447_v44 = vpop.eup %1446  ;;  %1466 = vpow2.f32 %v804_v38 }
 0x210   : > { %v1449_v46 = vpop.eup %1448  ;;  %1468 = vpow2.f32 %v806_v40  ;;  %v816_v47 = vadd.f32 %v1447_v44, %v1445_v42  ;;  %v857_v48 = vpack.c.bf16 %v1447_v44, %v1445_v42 }
 0x211   : > { %v1451_v49 = vpop.eup %1450  ;;  %1470 = vpow2.f32 %v808_v41  ;;  %v852_v41 = vmul.f32 %v1831_v39, %v842_v32  ;;  %v976_v39 = vld [vmem:[%s1922_s4 + $0x18] sm:$0xff] (!%p1260_p6) }
 0x212   : > { %v1453_v50 = vpop.eup %1452  ;;  %1472 = vpow2.f32 %v810_v43  ;;  %v817_v51 = vadd.f32 %v1449_v46, %v816_v47  ;;  %1328 = vmatprep.subr.bf16.mxu1 %v857_v48  ;;  %v858_v52 = vpack.c.bf16 %v1451_v49, %v1449_v46  ;;  %v975_v47 = vld [vmem:[%s1922_s4 + $0x10] sm:$0xff] (!%p1260_p6) }
 0x213   : > { %v1455_v53 = vpop.eup %1454  ;;  %1474 = vpow2.f32 %v812_v45  ;;  %1329 = vmatpush3.bf16.msra.mxu1 %v857_v48  ;;  %v973_v48 = vld [vmem:[%s1922_s4] sm:$0xff] (!%p1260_p6) }
 0x214   : > { %v1457_v54 = vpop.eup %1456  ;;  %v818_v55 = vadd.f32 %v1451_v49, %v817_v51  ;;  %1330 = vmatprep.subr.bf16.mxu1 %v858_v52  ;;  %v859_v56 = vpack.c.bf16 %v1455_v53, %v1453_v50  ;;  %v1570_v49 = vmov (!%p1260_p6), 0   ;;  %v1002_v51 = vld [vmem:[%s1949_s20 + $0x8] sm:$0xff] (!%p1260_p6) }
 0x215   : > { %v1459_v57 = vpop.eup %1458  ;;  %1477 = vset.pattern.permute.xlu1 (!%p1260_p6), %v1570_v49  ;;  %1476 = vset.pattern.permute.xlu0 (!%p1260_p6), %v1570_v49 }
 0x216   : > { %v1461_v58 = vpop.eup %1460  ;;  %v819_v59 = vadd.f32 %v1453_v50, %v818_v55  ;;  %v860_v60 = vpack.c.bf16 %v1459_v57, %v1457_v54  ;;  %989 = vperm.xlu1 (!%p1260_p6), %1477, %v975_v47   ;;  %979 = vperm.xlu0 (!%p1260_p6), %1476, %v973_v48   ;;  %v974_v50 = vld [vmem:[%s1922_s4 + $0x8] sm:$0xff] (!%p1260_p6) }
 0x217   : > { %v1463_v61 = vpop.eup %1462  ;;  %1331 = vmatpush3.bf16.msra.mxu1 %v858_v52  ;;  %v1001_v52 = vld [vmem:[%s1949_s20] sm:$0xff] (!%p1260_p6) }
 0x218   : > { %v1465_v62 = vpop.eup %1464  ;;  %v820_v63 = vadd.f32 %v1455_v53, %v819_v59  ;;  %1332 = vmatprep.subr.bf16.mxu1 %v859_v56  ;;  %v861_v0 = vpack.c.bf16 %v1463_v61, %v1461_v58  ;;  %v1004_v53 = vld [vmem:[%s1949_s20 + $0x18] sm:$0xff] (!%p1260_p6) }
 0x219   : > { %v1467_v1 = vpop.eup %1466 }
 0x21a   : > { %v1469_v2 = vpop.eup %1468  ;;  %v821_v3 = vadd.f32 %v1457_v54, %v820_v63  ;;  %v862_v4 = vpack.c.bf16 %v1467_v1, %v1465_v62  ;;  %994 = vperm.xlu1 (!%p1260_p6), %1477, %v976_v39   ;;  %984 = vperm.xlu0 (!%p1260_p6), %1476, %v974_v50   ;;  %v1003_v54 = vld [vmem:[%s1949_s20 + $0x10] sm:$0xff] (!%p1260_p6) }
 0x21b   : > { %v1471_v6 = vpop.eup %1470  ;;  %1333 = vmatpush3.bf16.msra.mxu1 %v859_v56 }
 0x21c   : > { %v1473_v7 = vpop.eup %1472  ;;  %v822_v8 = vadd.f32 %v1459_v57, %v821_v3  ;;  %1334 = vmatprep.subr.bf16.mxu1 %v860_v60  ;;  %v863_v9 = vpack.c.bf16 %v1471_v6, %v1469_v2 }
 0x21d   : > { %v1475_v10 = vpop.eup %1474 }
 0x21e   : > { %v823_v11 = vadd.f32 %v1461_v58, %v822_v8  ;;  %v864_v12 = vpack.c.bf16 %v1475_v10, %v1473_v7  ;;  %1012 = vperm.xlu1 (!%p1260_p6), %1477, %v1002_v51   ;;  %1007 = vperm.xlu0 (!%p1260_p6), %1476, %v1001_v52  }
 0x21f   : > { %1335 = vmatpush3.bf16.msra.mxu1 %v860_v60 }
 0x220   : > { %v824_v13 = vadd.f32 %v1463_v61, %v823_v11  ;;  %1336 = vmatprep.subr.bf16.mxu1 %v861_v0  ;;  %v1267_v61 = vld [vmem:[%s427_s10] sm:$0xff] (!%p1260_p6)  }
 0x221   : > { %v1269_v3 = vunpack.c.h.bf16 (!%p1260_p6), %v1267_v61 }
 0x222   : > { %v825_v14 = vadd.f32 %v1465_v62, %v824_v13  ;;  %1022 = vperm.xlu1 (!%p1260_p6), %1477, %v1004_v53   ;;  %1017 = vperm.xlu0 (!%p1260_p6), %1476, %v1003_v54  }
 0x223   : > { %1337 = vmatpush3.bf16.msra.mxu1 %v861_v0  ;;  %v956_v0 = vstv (!%p1260_p6), %s955_s21 }
 0x224   : > { %v826_v15 = vadd.f32 %v1467_v1, %v825_v14  ;;  %1338 = vmatprep.subr.bf16.mxu1 %v862_v4 }
 0x226   : > { %v827_v16 = vadd.f32 %v1469_v2, %v826_v15  ;;  %v1268_v2 = vunpack.c.l.bf16 (!%p1260_p6), %v1267_v61 }
 0x227   : > { %1339 = vmatpush3.bf16.msra.mxu1 %v862_v4 }
 0x228   : > { %v828_v17 = vadd.f32 %v1471_v6, %v827_v16  ;;  %1340 = vmatprep.subr.bf16.mxu1 %v863_v9  ;;  %v1274_v6 = vld [vmem:[%s427_s10 + $0x8] sm:$0xff] (!%p1260_p6)  }
 0x22a   : > { %v829_v18 = vadd.f32 %v1473_v7, %v828_v17 }
 0x22b   : > { %1341 = vmatpush3.bf16.msra.mxu1 %v863_v9 }
 0x22c   : > { %v830_v19 = vadd.f32 %v1475_v10, %v829_v18  ;;  %1342 = vmatprep.subr.bf16.mxu1 %v864_v12 }
 0x22e   : > { %v831_v20 = vrot.slane %v830_v19, 4 }
 0x22f   : > { %1343 = vmatpush3.bf16.msra.mxu1 %v864_v12  ;;  %v1273_v12 = vunpack.c.h.bf16 (!%p1260_p6), %v1274_v6 }
 0x230   : > { %v832_v22 = vadd.f32 %v831_v20, %v830_v19 }
 0x232   : > { %v833_v23 = vrot.slane %v832_v22, 2  ;;  %1345 = vmatmul.mubr.bf16.vlgmr.msra.gmra.mrb[0].mxu1 %v1441_v21 }
 0x234   : > { %v834_v24 = vadd.f32 %v833_v23, %v832_v22 }
 0x236   : > { %v835_v26 = vrot.slane %v834_v24, 1 }
 0x238   : > { %v836_v28 = vadd.f32 %v835_v26, %v834_v24 }
 0x23a   : > { %v837_v29 = vadd.f32 %v836_v28, %v815_v27 }
 0x23c   : > { %838 = vst [vmem:[#allocation3] sm:$0x1] %v837_v29 }
 0x243   : > { %v943_v55 = vld [vmem:[#allocation3] sm:$0x1] (!%p1260_p6) }
 0x244   : > { %1478 = vrcp.f32 (!%p1260_p6), %v943_v55 }
 0x24e   : > { %v1479_v56 = vpop.eup (!%p1260_p6), %1478 }
 0x24f   : > { %v949_v57 = vrot.slane (!%p1260_p6), %v1479_v56, %v1811_v5  ;;  %v1272_v5 = vunpack.c.l.bf16 (!%p1260_p6), %v1274_v6 }
 0x295   : > { %v990_v10 = vpop.permute.xlu1 (!%p1260_p6), %989  ;;  %v980_v11 = vpop.permute.xlu0 (!%p1260_p6), %979 }
 0x299   : > { %v995_v17 = vpop.permute.xlu1 (!%p1260_p6), %994  ;;  %v985_v18 = vpop.permute.xlu0 (!%p1260_p6), %984 }
 0x29d   : > { %v1013_v23 = vpop.permute.xlu1 (!%p1260_p6), %1012  ;;  %v1008_v24 = vpop.permute.xlu0 (!%p1260_p6), %1007 }
 0x2a1   : > { %v1023_v29 = vpop.permute.xlu1 (!%p1260_p6), %1022  ;;  %v1018_v30 = vpop.permute.xlu0 (!%p1260_p6), %1017 }
 0x305   : > { %v1346_v35 = vpop.f32.mrb[0].mxu1  ;;  %938 = sbr.rel (%p1260_p6) target bundleno = 798 (0x31e), region = 138 }
 0x306   : > { %v928_v38 = vadd.f32 %v1346_v35, %v851_v33  ;;  %v911_v40 = vpop.f32.mrb[1].mxu1 }
 0x307   : > { %v926_v42 = vadd.f32 %v911_v40, %v849_v37  ;;  %v1347_v43 = vpop.f32.mrb[2].mxu1 }
 0x308   : > { %932 = vst [vmem:[#allocation4 + $0x10] sm:$0xff] %v928_v38  ;;  %v929_v44 = vadd.f32 %v1347_v43, %v852_v41  ;;  %v914_v45 = vpop.f32.mrb[3].mxu1 }
 0x309   : > { %930 = vst [vmem:[#allocation4] sm:$0xff] %v926_v42  ;;  %v927_v46 = vadd.f32 %v914_v45, %v850_v36 }
 0x30a   : > { %933 = vst [vmem:[#allocation4 + $0x18] sm:$0xff] %v929_v44 }
 0x30b   : > { %931 = vst [vmem:[#allocation4 + $0x8] sm:$0xff] %v927_v46 }
 0x30f   : > { %v941_v63 = vld [vmem:[#allocation4 + $0x10] sm:$0xff] }
 0x310   : > { %v939_v58 = vld [vmem:[#allocation4] sm:$0xff]  ;;  %v953_v4 = vmul.f32 %v949_v57, %v941_v63 }
 0x311   : > { %v951_v60 = vmul.f32 %v949_v57, %v939_v58  ;;  %v942_v1 = vld [vmem:[#allocation4 + $0x18] sm:$0xff] }
 0x312   : > { %v940_v59 = vld [vmem:[#allocation4 + $0x8] sm:$0xff]  ;;  %v954_v8 = vmul.f32 %v949_v57, %v942_v1  ;;  %v959_v13 = vmul.f32 %v956_v0, %v953_v4 }
 0x313   : > { %v952_v62 = vmul.f32 %v949_v57, %v940_v59  ;;  %v957_v7 = vmul.f32 %v956_v0, %v951_v60 }
 0x314   : > { %v960_v15 = vmul.f32 %v956_v0, %v954_v8  ;;  %v971_v19 = vadd.f32 %v1272_v5, %v959_v13 }
 0x315   : > { %v958_v9 = vmul.f32 %v956_v0, %v952_v62  ;;  %v969_v14 = vadd.f32 %v1268_v2, %v957_v7 }
 0x316   : > { %v972_v21 = vadd.f32 %v1273_v12, %v960_v15  ;;  %v999_v27 = vmul.f32 %v990_v10, %v971_v19 }
 0x317   : > { %v970_v16 = vadd.f32 %v1269_v3, %v958_v9  ;;  %v997_v20 = vmul.f32 %v980_v11, %v969_v14 }
 0x318   : > { %v1000_v28 = vmul.f32 %v995_v17, %v972_v21  ;;  %v1027_v32 = vadd.f32 %v1018_v30, %v999_v27 }
 0x319   : > { %v998_v22 = vmul.f32 %v985_v18, %v970_v16  ;;  %v1025_v26 = vadd.f32 %v1008_v24, %v997_v20 }
 0x31a   : > { %v1028_v31 = vadd.f32 %v1023_v29, %v1000_v28  ;;  %1031 = vst [vmem:[%s1751_s7 + $0x10] sm:$0xff] %v1027_v32 }
 0x31b   : > { %v1026_v25 = vadd.f32 %v1013_v23, %v998_v22  ;;  %1029 = vst [vmem:[%s1751_s7] sm:$0xff] %v1025_v26 }
 0x31c   : > { %1032 = vst [vmem:[%s1751_s7 + $0x18] sm:$0xff] %v1028_v31 }
 0x31d   : > { %1030 = vst [vmem:[%s1751_s7 + $0x8] sm:$0xff] %v1026_v25 }
 0x31e PF: > { %1039 = sbr.rel (!%p1699_p9) target bundleno = 808 (0x328), region = 142  ;;  %s1262_s10 = sshll.u32 (%p1699_p9), %s1550_s9, 3 }
 0x31f   : > { %s1041_s15 = sadd.s32 (%p1699_p9), %s1546_s8, %s1262_s10  ;;  %s1950_s12 = sld [smem:[#allocation19_spill]] (%p1699_p9) }
 0x320   : > { %s1263_s2 = sshll.u32 (%p1699_p9), %s1041_s15, 3 }
 0x321   : > { %v1081_v35 = vld [vmem:[%s1751_s7 + $0x10] sm:$0xff] (%p1699_p9) }
 0x322   : > { %v1077_v33 = vld [vmem:[%s1751_s7] sm:$0xff] (%p1699_p9) }
 0x323   : > { %v1083_v37 = vld [vmem:[%s1751_s7 + $0x18] sm:$0xff] (%p1699_p9) }
 0x324   : > { %v1079_v34 = vld [vmem:[%s1751_s7 + $0x8] sm:$0xff] (%p1699_p9) }
 0x325   : > { %s1043_s24 = scalar_lea.vmem %s1950_s12, %s1263_s2 }
 0x326   : > { %1078 = vst [vmem:[%s1043_s24] sm:$0xff] %v1077_v33  ;;  %1080 = vst [vmem:[%s1043_s24 + $0x10] sm:$0xff] %v1079_v34 }
 0x327   : > { %1082 = vst [vmem:[%s1043_s24 + $0x20] sm:$0xff] %v1081_v35  ;;  %1084 = vst [vmem:[%s1043_s24 + $0x30] sm:$0xff] %v1083_v37 }
 0x328 PF: > { %s18_s6 = sadd.s32 1, %s1566_s6   ;;  %s1951_s8 = sld [smem:[#allocation15_spill]] }
 0x329   : > { %p15_p7 = scmp.ge.s32.totalorder %s18_s6, 10   ;;  %s1952_s30 = sld [smem:[#allocation9_spill]] }
 0x32a   : > { %s1953_s7 = sld [smem:[#allocation10_spill]]  ;;  %s1954_s9 = sld [smem:[#allocation11_spill]] }
 0x32b   : > { %s1955_s10 = sld [smem:[#allocation12_spill]]  ;;  %s1956_s11 = sld [smem:[#allocation13_spill]] }
 0x32c   : > { %s1957_s12 = sld [smem:[#allocation14_spill]]  ;;  %s1958_s26 = smov %s1530_s27 }
 0x32d   : > { %s1959_s27 = smov %s1710_s5  ;;  %s1960_s28 = smov %s1538_s29 }
 0x32e   : > { %s1961_s29 = smov %s1951_s8  ;;  %17 = sbr.rel (!%p15_p7) target bundleno = 12 (0xc), region = 225 }
 0x330   : > { %s1962_s8 = smov %s1953_s7 }

</bundles_post_ra>
